<compile_context>
chip_gen: v7x
topology: tpu7x:2x2x1
jax: 0.10.0
libtpu: 0.0.40
codegen_flags: <defaults>
</compile_context>

<pallas_src>
import numpy as np
import jax
import jax.numpy as jnp
from jax.experimental import pallas as pl
from jax.experimental.pallas import tpu as pltpu

D = 4          # number of vector-map components (first ctor argument of VectorMapConv)
K = 3          # kernel_size of every layer
NTAPS = K * K  # 9
CP = 8         # channel padding (4 -> 8 sublanes) for the network input / output


# ----------------------------------------------------------------------------
# Host-side (numpy) construction of per-image tap gather maps & stacked matrices
# ----------------------------------------------------------------------------
def _tap_source_indices(Hi, Wi, Ho, Wo, k, stride, pad, transposed):
    """idx[t, r] = source input pixel (row-major) feeding output pixel r through tap
    t = kh*k + kw, or -1 if it falls on padding / a stride-dilation hole."""
    idx = np.full((k * k, Ho * Wo), -1, dtype=np.int32)
    for kh in range(k):
        for kw in range(k):
            t = kh * k + kw
            for ho in range(Ho):
                for wo in range(Wo):
                    if transposed:
                        ah, aw = ho + pad - kh, wo + pad - kw
                        if ah % stride or aw % stride:
                            continue
                        hi, wi = ah // stride, aw // stride
                    else:
                        hi, wi = ho * stride - pad + kh, wo * stride - pad + kw
                    if 0 <= hi < Hi and 0 <= wi < Wi:
                        idx[t, ho * Wo + wo] = hi * Wi + wi
    return idx


def _stack_T_cols(idx, m_in):
    """T_hcat (m_in, 9*Mo): columns [t*Mo:(t+1)*Mo] = one-hot gather matrix of tap t."""
    T_, mo = idx.shape
    M = np.zeros((m_in, T_ * mo), np.float32)
    t_ix, r_ix = np.nonzero(idx >= 0)
    M[idx[t_ix, r_ix], t_ix * mo + r_ix] = 1.0
    return M


def _stack_T_rows(idx, m_in):
    """T_vcat (9*m_in, Mo): rows [t*m_in:(t+1)*m_in] = one-hot gather matrix of tap t."""
    T_, mo = idx.shape
    M = np.zeros((T_ * m_in, mo), np.float32)
    t_ix, r_ix = np.nonzero(idx >= 0)
    M[t_ix * m_in + idx[t_ix, r_ix], r_ix] = 1.0
    return M


def _conv_taps(Wc):     # Conv2d weight (Co, Ci, k, k)          -> (k*k, Co, Ci)
    Co, Ci, k, _ = Wc.shape
    return np.transpose(np.asarray(Wc), (2, 3, 0, 1)).reshape(k * k, Co, Ci)


def _convT_taps(Wt):    # ConvTranspose2d weight (Ci, Co, k, k) -> (k*k, Co, Ci)
    Ci, Co, k, _ = Wt.shape
    return np.transpose(np.asarray(Wt), (2, 3, 1, 0)).reshape(k * k, Co, Ci)


def _stack_V_cols(v_taps, ci_pad=None):
    """Vp (Co, 9*ci_pad): Vp[c, t*ci_pad + i] = V_tap[t][c, i] (zero on padded i)."""
    T_, Co, Ci = v_taps.shape
    ci_pad = ci_pad or Ci
    M = np.zeros((Co, T_ * ci_pad), np.float32)
    for t in range(T_):
        M[:, t * ci_pad:t * ci_pad + Ci] = v_taps[t]
    return M


def _stack_V_rows(v_taps, co_pad=None):
    """Vv (9*co_pad, Ci): Vv[t*co_pad + c, :] = V_tap[t][c, :] (zero rows on padded c)."""
    T_, Co, Ci = v_taps.shape
    co_pad = co_pad or Co
    M = np.zeros((T_ * co_pad, Ci), np.float32)
    for t in range(T_):
        M[t * co_pad:t * co_pad + Co, :] = v_taps[t]
    return M


# ----------------------------------------------------------------------------
# The fused Pallas kernel: e1 -> e2 -> d5 -> d6 (+ output Hardtanh), one image/step
# ----------------------------------------------------------------------------
def _vcae_kernel(x_ref,
                 t1_ref, v1_ref, b1_ref,     # e1  (T-first, bf16 T)
                 v2_ref, t2_ref, b2_ref,     # e2  (V-first, f32 T)
                 t3_ref, v3_ref, b3_ref,     # d5  (T-first, f32 T)
                 v4_ref, t4_ref, b4_ref,     # d6  (V-first, bf16 T)
                 o_ref):
    f32 = jnp.float32

    def hardtanh(v):
        return jnp.clip(v, -1.0, 1.0)

    def t_first_layer(x, th_ref, vp_ref, b_ref):
        # out = sum_t V[t] @ (x @ T[t]):
        #   one stacked gather matmul, one slice+concat relayout (taps -> contraction
        #   rows, all pieces 8-row aligned / 64+ lanes), one channel-mixing matmul.
        mo = th_ref.shape[1] // NTAPS
        g = jnp.dot(x.astype(th_ref.dtype), th_ref[...],
                    preferred_element_type=f32)                            # (Ci, 9*Mo)
        gr = jnp.concatenate(
            [g[:, t * mo:(t + 1) * mo] for t in range(NTAPS)], axis=0)     # (9*Ci, Mo)
        return jnp.dot(vp_ref[...], gr, preferred_element_type=f32) + b_ref[...]

    def v_first_layer(x, vv_ref, tv_ref, b_ref):
        # out = sum_t (V[t] @ x) @ T[t]:
        #   one stacked channel-mixing matmul, one slice+concat relayout (taps ->
        #   contraction lanes), one scatter matmul against the stacked T.
        co = vv_ref.shape[0] // NTAPS
        y = jnp.dot(vv_ref[...], x, preferred_element_type=f32)            # (9*Co, Mi)
        yr = jnp.concatenate(
            [y[t * co:(t + 1) * co, :] for t in range(NTAPS)], axis=1)     # (Co, 9*Mi)
        return jnp.dot(yr.astype(tv_ref.dtype), tv_ref[...],
                       preferred_element_type=f32) + b_ref[...]

    x0 = x_ref[0]                                                # (8, H*W)  padded NCHW
    x1 = hardtanh(t_first_layer(x0, t1_ref, v1_ref, b1_ref))     # e1 -> (32, H*W/4)
    x2 = hardtanh(v_first_layer(x1, v2_ref, t2_ref, b2_ref))     # e2 -> (40, H*W/16)
    x3 = hardtanh(t_first_layer(x2, t3_ref, v3_ref, b3_ref))     # d5 -> (32, H*W/4)
    x4 = hardtanh(v_first_layer(x3, v4_ref, t4_ref, b4_ref))     # d6 -> (8,  H*W)
    o_ref[0] = x4                                                # dense (8, H*W) store


# ----------------------------------------------------------------------------
# Wrapper: constant preparation (once) + forward (jit)
# ----------------------------------------------------------------------------
def prepare_vcae(params, H, W):
    """Precompute per-image stacked tap-selection and vector-map weight matrices."""
    assert H % 4 == 0 and W % 4 == 0
    H1, W1 = H // 2, W // 2            # e1 output
    H2, W2 = H1 // 2, W1 // 2          # e2 output
    H3, W3 = 2 * H2, 2 * W2            # d5 output
    H4, W4 = 2 * H3, 2 * W3            # d6 output
    assert (H4, W4) == (H, W)

    idx1 = _tap_source_indices(H, W, H1, W1, K, 2, 1, transposed=False)
    idx2 = _tap_source_indices(H1, W1, H2, W2, K, 2, 1, transposed=False)
    idx3 = _tap_source_indices(H2, W2, H3, W3, K, 2, 1, transposed=True)
    idx4 = _tap_source_indices(H3, W3, H4, W4, K, 2, 1, transposed=True)

    (W1_, b1), (W2_, b2) = params["e1"], params["e2"]
    (W3_, b3), (W4_, b4) = params["d5"], params["d6"]
    v1t, v2t = _conv_taps(W1_), _conv_taps(W2_)
    v3t, v4t = _convT_taps(W3_), _convT_taps(W4_)

    consts = (
        # e1 (T-first): big selection matrix in bf16 (exact 0/1), Ci padded 4 -> 8
        jnp.asarray(_stack_T_cols(idx1, H * W), jnp.bfloat16),             # (HW, 9*H1W1)
        jnp.asarray(_stack_V_cols(v1t, ci_pad=CP), jnp.float32),           # (32, 9*8)
        jnp.asarray(np.asarray(b1).reshape(-1, 1), jnp.float32),           # (32, 1)
        # e2 (V-first): small selection matrix stays f32 (no activation rounding)
        jnp.asarray(_stack_V_rows(v2t), jnp.float32),                      # (9*40, 32)
        jnp.asarray(_stack_T_rows(idx2, H1 * W1), jnp.float32),            # (9*H1W1, H2W2)
        jnp.asarray(np.asarray(b2).reshape(-1, 1), jnp.float32),           # (40, 1)
        # d5 (T-first): small selection matrix stays f32
        jnp.asarray(_stack_T_cols(idx3, H2 * W2), jnp.float32),            # (H2W2, 9*H3W3)
        jnp.asarray(_stack_V_cols(v3t), jnp.float32),                      # (32, 9*40)
        jnp.asarray(np.asarray(b3).reshape(-1, 1), jnp.float32),           # (32, 1)
        # d6 (V-first): big selection matrix in bf16, Co padded 4 -> 8
        jnp.asarray(_stack_V_rows(v4t, co_pad=CP), jnp.float32),           # (9*8, 32)
        jnp.asarray(_stack_T_rows(idx4, H3 * W3), jnp.bfloat16),           # (9*H3W3, HW)
        jnp.asarray(np.pad(np.asarray(b4).reshape(-1, 1),
                           ((0, CP - int(b4.shape[0])), (0, 0))), jnp.float32),  # (8, 1)
    )
    return {"consts": consts}


def vcae_forward(packed, x):
    """x: (N, 4, H, W) NCHW float32 -> (N, 4, H, W) NCHW (matches VCAE.forward)."""
    consts = packed["consts"]
    (t1h, v1p, b1, vv2, t2v, b2, t3h, v3p, b3, vv4, t4v, b4p) = consts
    N, C, H, W = x.shape
    HW = H * W

    # Channel-major, channel-padded input (N, 8, H*W): NCHW -> pure reshape + zero pad
    # (no transpose / gather glue around the kernel).
    xp = jnp.pad(x.reshape(N, C, HW), ((0, 0), (0, CP - C), (0, 0)))
    args = (xp,) + consts

    def _const_spec(a):
        zero = (0,) * a.ndim
        return pl.BlockSpec(a.shape, lambda n: zero)    # fetched once, VMEM-resident

    in_specs = [pl.BlockSpec((1, CP, HW), lambda n: (n, 0, 0))]
    in_specs += [_const_spec(a) for a in consts]
    out_specs = pl.BlockSpec((1, CP, HW), lambda n: (n, 0, 0))
    out_shape = jax.ShapeDtypeStruct((N, CP, HW), jnp.float32)

    # Advisory cost estimate (8 matmuls per image).
    def mm(m, k, n):
        return 2 * m * k * n
    m1 = HW // 4
    co2, co4 = vv2.shape[0] // NTAPS, vv4.shape[0] // NTAPS
    flops = N * (
        mm(CP, t1h.shape[0], t1h.shape[1]) + mm(v1p.shape[0], v1p.shape[1], m1)
        + mm(vv2.shape[0], vv2.shape[1], m1) + mm(co2, t2v.shape[0], t2v.shape[1])
        + mm(co2, t3h.shape[0], t3h.shape[1]) + mm(v3p.shape[0], v3p.shape[1], m1)
        + mm(vv4.shape[0], vv4.shape[1], m1) + mm(co4, t4v.shape[0], t4v.shape[1]))
    bytes_accessed = sum(int(np.prod(a.shape)) * a.dtype.itemsize for a in args) \
        + N * CP * HW * 4

    out = pl.pallas_call(
        _vcae_kernel,
        out_shape=out_shape,
        grid=(N,),
        in_specs=in_specs,
        out_specs=out_specs,
        compiler_params=pltpu.CompilerParams(dimension_semantics=("parallel",)),
        cost_estimate=pl.CostEstimate(flops=int(flops), transcendentals=0,
                                      bytes_accessed=int(bytes_accessed)),
    )(*args)

    # Drop the channel padding; columns are already in (h, w) row-major order.
    return out[:, :C, :].reshape(N, C, H, W)


# ----------------------------------------------------------------------------
# Vector-map weight construction (deterministic synthetic init)
# ----------------------------------------------------------------------------
def _sign_matrix(d):
    # TODO(synk): exact init of VectorMapConv's learnable sign/scale matrix lives in
    # vectormap_layers.py (not provided); use the quaternion-like sign pattern for D=4.
    if d == 4:
        return jnp.array([[1, -1, -1, -1],
                          [1,  1, -1,  1],
                          [1,  1,  1, -1],
                          [1, -1,  1,  1]], dtype=jnp.float32)
    return jnp.ones((d, d), dtype=jnp.float32)


def _init_vectormap_layer(key, c_in, c_out, k, transpose=False):
    """Builds the full block-circulant weight from D component kernels + bias."""
    kw_, kb_ = jax.random.split(key)
    if transpose:
        comp_shape = (D, c_in // D, c_out // D, k, k)   # ConvTranspose2d: (in, out, k, k)
    else:
        comp_shape = (D, c_out // D, c_in // D, k, k)   # Conv2d: (out, in, k, k)
    fan_in = c_in * k * k
    comp = jax.random.normal(kw_, comp_shape, jnp.float32) / np.sqrt(fan_in)
    L = _sign_matrix(D)
    rows = []
    for i in range(D):
        row = [L[i, j] * comp[(i + j) % D] for j in range(D)]
        rows.append(jnp.concatenate(row, axis=1))
    W = jnp.concatenate(rows, axis=0)                    # (c_out,c_in,k,k) / (c_in,c_out,k,k)
    b = 0.01 * jax.random.normal(kb_, (c_out,), jnp.float32)
    return W, b


# ----------------------------------------------------------------------------
# Pure-JAX reference for correctness checking
# ----------------------------------------------------------------------------
def _ref_conv(x, W, b, stride, pad):
    out = jax.lax.conv_general_dilated(
        x, W, (stride, stride), ((pad, pad), (pad, pad)),
        dimension_numbers=("NCHW", "OIHW", "NCHW"))
    return out + b.reshape(1, -1, 1, 1)


def _ref_convT(x, Wt, b, stride, pad, out_pad):
    Wc = jnp.flip(Wt, axis=(-2, -1)).transpose(1, 0, 2, 3)
    lo, hi = Wt.shape[-1] - 1 - pad, Wt.shape[-1] - 1 - pad + out_pad
    out = jax.lax.conv_general_dilated(
        x, Wc, (1, 1), ((lo, hi), (lo, hi)), lhs_dilation=(stride, stride),
        dimension_numbers=("NCHW", "OIHW", "NCHW"))
    return out + b.reshape(1, -1, 1, 1)


def vcae_reference(params, x):
    ht = lambda t: jnp.clip(t, -1.0, 1.0)
    e1 = ht(_ref_conv(x, *params["e1"], 2, 1))
    e2 = ht(_ref_conv(e1, *params["e2"], 2, 1))
    d5 = ht(_ref_convT(e2, *params["d5"], 2, 1, 1))
    d6 = ht(_ref_convT(d5, *params["d6"], 2, 1, 1))
    return d6


if __name__ == "__main__":
    key = jax.random.PRNGKey(0)
    kx, k1, k2, k3, k4 = jax.random.split(key, 5)

    x = jax.random.normal(kx, (2, 4, 16, 16), jnp.float32)   # NCHW, like PyTorch

    params = {
        "e1": _init_vectormap_layer(k1, 4, 32, 3),                   # VectorMapConv(4, 4, 32)
        "e2": _init_vectormap_layer(k2, 32, 40, 3),                  # VectorMapConv(4, 32, 40)
        "d5": _init_vectormap_layer(k3, 40, 32, 3, transpose=True),  # VectorMapTransposeConv(4, 40, 32)
        "d6": _init_vectormap_layer(k4, 32, 4, 3, transpose=True),   # VectorMapTransposeConv(4, 32, 4)
    }

    packed = prepare_vcae(params, H=16, W=16)
    fwd = jax.jit(vcae_forward)

    out = jax.block_until_ready(fwd(packed, x))
    assert out.shape == (2, 4, 16, 16), out.shape

    ref = jax.block_until_ready(vcae_reference(params, x))
    # The 0/1 selection matrices are exact in bf16; the only deviation from the f32
    # reference is two bf16 roundings of activations (e1 input / d6 contributions),
    # which stays well below the 2e-2 tolerance on Hardtanh-bounded outputs.
    np.testing.assert_allclose(np.asarray(out), np.asarray(ref), atol=2e-2, rtol=2e-2)

    print("KERNEL_OK")
</pallas_src>

<mosaic_0001>
module attributes {stable_mosaic.version = 11 : i64} {
  func.func @_vcae_kernel(%arg0: i32, %arg1: memref<1x8x256xf32, #tpu.memory_space<vmem>>, %arg2: memref<256x576xbf16, #tpu.memory_space<vmem>>, %arg3: memref<32x72xf32, #tpu.memory_space<vmem>>, %arg4: memref<32x1xf32, #tpu.memory_space<vmem>>, %arg5: memref<360x32xf32, #tpu.memory_space<vmem>>, %arg6: memref<576x16xf32, #tpu.memory_space<vmem>>, %arg7: memref<40x1xf32, #tpu.memory_space<vmem>>, %arg8: memref<16x576xf32, #tpu.memory_space<vmem>>, %arg9: memref<32x360xf32, #tpu.memory_space<vmem>>, %arg10: memref<32x1xf32, #tpu.memory_space<vmem>>, %arg11: memref<72x32xf32, #tpu.memory_space<vmem>>, %arg12: memref<576x256xbf16, #tpu.memory_space<vmem>>, %arg13: memref<8x1xf32, #tpu.memory_space<vmem>>, %arg14: memref<1x8x256xf32, #tpu.memory_space<vmem>>) attributes {dimension_semantics = [#tpu.dimension_semantics<parallel>], iteration_bounds = array<i64: 2>, scalar_prefetch = 0 : i64, scratch_operands = 0 : i64, tpu.core_type = #tpu.core_type<tc>, window_params = [{transform_indices = @transform_0, window_bounds = array<i64: 1, 8, 256>}, {pipeline_mode = #tpu.pipeline_mode<synchronous>, transform_indices = @transform_1, window_bounds = array<i64: 256, 576>}, {pipeline_mode = #tpu.pipeline_mode<synchronous>, transform_indices = @transform_2, window_bounds = array<i64: 32, 72>}, {pipeline_mode = #tpu.pipeline_mode<synchronous>, transform_indices = @transform_3, window_bounds = array<i64: 32, 1>}, {pipeline_mode = #tpu.pipeline_mode<synchronous>, transform_indices = @transform_4, window_bounds = array<i64: 360, 32>}, {pipeline_mode = #tpu.pipeline_mode<synchronous>, transform_indices = @transform_5, window_bounds = array<i64: 576, 16>}, {pipeline_mode = #tpu.pipeline_mode<synchronous>, transform_indices = @transform_6, window_bounds = array<i64: 40, 1>}, {pipeline_mode = #tpu.pipeline_mode<synchronous>, transform_indices = @transform_7, window_bounds = array<i64: 16, 576>}, {pipeline_mode = #tpu.pipeline_mode<synchronous>, transform_indices = @transform_8, window_bounds = array<i64: 32, 360>}, {pipeline_mode = #tpu.pipeline_mode<synchronous>, transform_indices = @transform_9, window_bounds = array<i64: 32, 1>}, {pipeline_mode = #tpu.pipeline_mode<synchronous>, transform_indices = @transform_10, window_bounds = array<i64: 72, 32>}, {pipeline_mode = #tpu.pipeline_mode<synchronous>, transform_indices = @transform_11, window_bounds = array<i64: 576, 256>}, {pipeline_mode = #tpu.pipeline_mode<synchronous>, transform_indices = @transform_12, window_bounds = array<i64: 8, 1>}, {transform_indices = @transform_13, window_bounds = array<i64: 1, 8, 256>}]} {
    %c0 = arith.constant 0 : index
    %c0_0 = arith.constant 0 : index
    %c0_1 = arith.constant 0 : index
    %0 = vector.load %arg1[%c0, %c0_0, %c0_1] : memref<1x8x256xf32, #tpu.memory_space<vmem>>, vector<1x8x256xf32>
    %1 = vector.shape_cast %0 : vector<1x8x256xf32> to vector<8x256xf32>
    %2 = arith.truncf %1 : vector<8x256xf32> to vector<8x256xbf16>
    %c0_2 = arith.constant 0 : index
    %c0_3 = arith.constant 0 : index
    %3 = vector.load %arg2[%c0_2, %c0_3] : memref<256x576xbf16, #tpu.memory_space<vmem>>, vector<256x576xbf16>
    %cst = arith.constant dense<0.000000e+00> : vector<8x576xf32>
    %4 = tpu.matmul %2, %3, %cst {dimension_numbers = #tpu.dot_dimension_numbers<[1], [0], [0], [1], [0, 0, 1, 1], [], []>} : vector<8x256xbf16>, vector<256x576xbf16>, vector<8x576xf32> -> vector<8x576xf32>
    %5 = vector.extract_strided_slice %4 {offsets = [0, 0], sizes = [8, 64], strides = [1, 1]} : vector<8x576xf32> to vector<8x64xf32>
    %6 = vector.extract_strided_slice %4 {offsets = [0, 64], sizes = [8, 64], strides = [1, 1]} : vector<8x576xf32> to vector<8x64xf32>
    %7 = vector.extract_strided_slice %4 {offsets = [0, 128], sizes = [8, 64], strides = [1, 1]} : vector<8x576xf32> to vector<8x64xf32>
    %8 = vector.extract_strided_slice %4 {offsets = [0, 192], sizes = [8, 64], strides = [1, 1]} : vector<8x576xf32> to vector<8x64xf32>
    %9 = vector.extract_strided_slice %4 {offsets = [0, 256], sizes = [8, 64], strides = [1, 1]} : vector<8x576xf32> to vector<8x64xf32>
    %10 = vector.extract_strided_slice %4 {offsets = [0, 320], sizes = [8, 64], strides = [1, 1]} : vector<8x576xf32> to vector<8x64xf32>
    %11 = vector.extract_strided_slice %4 {offsets = [0, 384], sizes = [8, 64], strides = [1, 1]} : vector<8x576xf32> to vector<8x64xf32>
    %12 = vector.extract_strided_slice %4 {offsets = [0, 448], sizes = [8, 64], strides = [1, 1]} : vector<8x576xf32> to vector<8x64xf32>
    %13 = vector.extract_strided_slice %4 {offsets = [0, 512], sizes = [8, 64], strides = [1, 1]} : vector<8x576xf32> to vector<8x64xf32>
    %14 = tpu.concatenate %5, %6, %7, %8, %9, %10, %11, %12, %13 in 0 : vector<8x64xf32>, vector<8x64xf32>, vector<8x64xf32>, vector<8x64xf32>, vector<8x64xf32>, vector<8x64xf32>, vector<8x64xf32>, vector<8x64xf32>, vector<8x64xf32> -> vector<72x64xf32>
    %c0_4 = arith.constant 0 : index
    %c0_5 = arith.constant 0 : index
    %15 = vector.load %arg3[%c0_4, %c0_5] : memref<32x72xf32, #tpu.memory_space<vmem>>, vector<32x72xf32>
    %cst_6 = arith.constant dense<0.000000e+00> : vector<32x64xf32>
    %16 = tpu.matmul %15, %14, %cst_6 {dimension_numbers = #tpu.dot_dimension_numbers<[1], [0], [0], [1], [0, 0, 1, 1], [], []>} : vector<32x72xf32>, vector<72x64xf32>, vector<32x64xf32> -> vector<32x64xf32>
    %c0_7 = arith.constant 0 : index
    %c0_8 = arith.constant 0 : index
    %17 = vector.load %arg4[%c0_7, %c0_8] : memref<32x1xf32, #tpu.memory_space<vmem>>, vector<32x1xf32>
    %18 = vector.broadcast %17 : vector<32x1xf32> to vector<32x64xf32>
    %19 = arith.addf %16, %18 : vector<32x64xf32>
    %cst_9 = arith.constant -1.000000e+00 : f32
    %cst_10 = arith.constant 1.000000e+00 : f32
    %20 = vector.broadcast %cst_9 : f32 to vector<32x64xf32>
    %21 = arith.maximumf %20, %19 : vector<32x64xf32>
    %22 = vector.broadcast %cst_10 : f32 to vector<32x64xf32>
    %23 = arith.minimumf %22, %21 : vector<32x64xf32>
    %c0_11 = arith.constant 0 : index
    %c0_12 = arith.constant 0 : index
    %24 = vector.load %arg5[%c0_11, %c0_12] : memref<360x32xf32, #tpu.memory_space<vmem>>, vector<360x32xf32>
    %cst_13 = arith.constant dense<0.000000e+00> : vector<360x64xf32>
    %25 = tpu.matmul %24, %23, %cst_13 {dimension_numbers = #tpu.dot_dimension_numbers<[1], [0], [0], [1], [0, 0, 1, 1], [], []>} : vector<360x32xf32>, vector<32x64xf32>, vector<360x64xf32> -> vector<360x64xf32>
    %26 = vector.extract_strided_slice %25 {offsets = [0, 0], sizes = [40, 64], strides = [1, 1]} : vector<360x64xf32> to vector<40x64xf32>
    %27 = vector.extract_strided_slice %25 {offsets = [40, 0], sizes = [40, 64], strides = [1, 1]} : vector<360x64xf32> to vector<40x64xf32>
    %28 = vector.extract_strided_slice %25 {offsets = [80, 0], sizes = [40, 64], strides = [1, 1]} : vector<360x64xf32> to vector<40x64xf32>
    %29 = vector.extract_strided_slice %25 {offsets = [120, 0], sizes = [40, 64], strides = [1, 1]} : vector<360x64xf32> to vector<40x64xf32>
    %30 = vector.extract_strided_slice %25 {offsets = [160, 0], sizes = [40, 64], strides = [1, 1]} : vector<360x64xf32> to vector<40x64xf32>
    %31 = vector.extract_strided_slice %25 {offsets = [200, 0], sizes = [40, 64], strides = [1, 1]} : vector<360x64xf32> to vector<40x64xf32>
    %32 = vector.extract_strided_slice %25 {offsets = [240, 0], sizes = [40, 64], strides = [1, 1]} : vector<360x64xf32> to vector<40x64xf32>
    %33 = vector.extract_strided_slice %25 {offsets = [280, 0], sizes = [40, 64], strides = [1, 1]} : vector<360x64xf32> to vector<40x64xf32>
    %34 = vector.extract_strided_slice %25 {offsets = [320, 0], sizes = [40, 64], strides = [1, 1]} : vector<360x64xf32> to vector<40x64xf32>
    %35 = tpu.concatenate %26, %27, %28, %29, %30, %31, %32, %33, %34 in 1 : vector<40x64xf32>, vector<40x64xf32>, vector<40x64xf32>, vector<40x64xf32>, vector<40x64xf32>, vector<40x64xf32>, vector<40x64xf32>, vector<40x64xf32>, vector<40x64xf32> -> vector<40x576xf32>
    %c0_14 = arith.constant 0 : index
    %c0_15 = arith.constant 0 : index
    %36 = vector.load %arg6[%c0_14, %c0_15] : memref<576x16xf32, #tpu.memory_space<vmem>>, vector<576x16xf32>
    %cst_16 = arith.constant dense<0.000000e+00> : vector<40x16xf32>
    %37 = tpu.matmul %35, %36, %cst_16 {dimension_numbers = #tpu.dot_dimension_numbers<[1], [0], [0], [1], [0, 0, 1, 1], [], []>} : vector<40x576xf32>, vector<576x16xf32>, vector<40x16xf32> -> vector<40x16xf32>
    %c0_17 = arith.constant 0 : index
    %c0_18 = arith.constant 0 : index
    %38 = vector.load %arg7[%c0_17, %c0_18] : memref<40x1xf32, #tpu.memory_space<vmem>>, vector<40x1xf32>
    %39 = vector.broadcast %38 : vector<40x1xf32> to vector<40x16xf32>
    %40 = arith.addf %37, %39 : vector<40x16xf32>
    %cst_19 = arith.constant -1.000000e+00 : f32
    %cst_20 = arith.constant 1.000000e+00 : f32
    %41 = vector.broadcast %cst_19 : f32 to vector<40x16xf32>
    %42 = arith.maximumf %41, %40 : vector<40x16xf32>
    %43 = vector.broadcast %cst_20 : f32 to vector<40x16xf32>
    %44 = arith.minimumf %43, %42 : vector<40x16xf32>
    %c0_21 = arith.constant 0 : index
    %c0_22 = arith.constant 0 : index
    %45 = vector.load %arg8[%c0_21, %c0_22] : memref<16x576xf32, #tpu.memory_space<vmem>>, vector<16x576xf32>
    %cst_23 = arith.constant dense<0.000000e+00> : vector<40x576xf32>
    %46 = tpu.matmul %44, %45, %cst_23 {dimension_numbers = #tpu.dot_dimension_numbers<[1], [0], [0], [1], [0, 0, 1, 1], [], []>} : vector<40x16xf32>, vector<16x576xf32>, vector<40x576xf32> -> vector<40x576xf32>
    %47 = vector.extract_strided_slice %46 {offsets = [0, 0], sizes = [40, 64], strides = [1, 1]} : vector<40x576xf32> to vector<40x64xf32>
    %48 = vector.extract_strided_slice %46 {offsets = [0, 64], sizes = [40, 64], strides = [1, 1]} : vector<40x576xf32> to vector<40x64xf32>
    %49 = vector.extract_strided_slice %46 {offsets = [0, 128], sizes = [40, 64], strides = [1, 1]} : vector<40x576xf32> to vector<40x64xf32>
    %50 = vector.extract_strided_slice %46 {offsets = [0, 192], sizes = [40, 64], strides = [1, 1]} : vector<40x576xf32> to vector<40x64xf32>
    %51 = vector.extract_strided_slice %46 {offsets = [0, 256], sizes = [40, 64], strides = [1, 1]} : vector<40x576xf32> to vector<40x64xf32>
    %52 = vector.extract_strided_slice %46 {offsets = [0, 320], sizes = [40, 64], strides = [1, 1]} : vector<40x576xf32> to vector<40x64xf32>
    %53 = vector.extract_strided_slice %46 {offsets = [0, 384], sizes = [40, 64], strides = [1, 1]} : vector<40x576xf32> to vector<40x64xf32>
    %54 = vector.extract_strided_slice %46 {offsets = [0, 448], sizes = [40, 64], strides = [1, 1]} : vector<40x576xf32> to vector<40x64xf32>
    %55 = vector.extract_strided_slice %46 {offsets = [0, 512], sizes = [40, 64], strides = [1, 1]} : vector<40x576xf32> to vector<40x64xf32>
    %56 = tpu.concatenate %47, %48, %49, %50, %51, %52, %53, %54, %55 in 0 : vector<40x64xf32>, vector<40x64xf32>, vector<40x64xf32>, vector<40x64xf32>, vector<40x64xf32>, vector<40x64xf32>, vector<40x64xf32>, vector<40x64xf32>, vector<40x64xf32> -> vector<360x64xf32>
    %c0_24 = arith.constant 0 : index
    %c0_25 = arith.constant 0 : index
    %57 = vector.load %arg9[%c0_24, %c0_25] : memref<32x360xf32, #tpu.memory_space<vmem>>, vector<32x360xf32>
    %cst_26 = arith.constant dense<0.000000e+00> : vector<32x64xf32>
    %58 = tpu.matmul %57, %56, %cst_26 {dimension_numbers = #tpu.dot_dimension_numbers<[1], [0], [0], [1], [0, 0, 1, 1], [], []>} : vector<32x360xf32>, vector<360x64xf32>, vector<32x64xf32> -> vector<32x64xf32>
    %c0_27 = arith.constant 0 : index
    %c0_28 = arith.constant 0 : index
    %59 = vector.load %arg10[%c0_27, %c0_28] : memref<32x1xf32, #tpu.memory_space<vmem>>, vector<32x1xf32>
    %60 = vector.broadcast %59 : vector<32x1xf32> to vector<32x64xf32>
    %61 = arith.addf %58, %60 : vector<32x64xf32>
    %cst_29 = arith.constant -1.000000e+00 : f32
    %cst_30 = arith.constant 1.000000e+00 : f32
    %62 = vector.broadcast %cst_29 : f32 to vector<32x64xf32>
    %63 = arith.maximumf %62, %61 : vector<32x64xf32>
    %64 = vector.broadcast %cst_30 : f32 to vector<32x64xf32>
    %65 = arith.minimumf %64, %63 : vector<32x64xf32>
    %c0_31 = arith.constant 0 : index
    %c0_32 = arith.constant 0 : index
    %66 = vector.load %arg11[%c0_31, %c0_32] : memref<72x32xf32, #tpu.memory_space<vmem>>, vector<72x32xf32>
    %cst_33 = arith.constant dense<0.000000e+00> : vector<72x64xf32>
    %67 = tpu.matmul %66, %65, %cst_33 {dimension_numbers = #tpu.dot_dimension_numbers<[1], [0], [0], [1], [0, 0, 1, 1], [], []>} : vector<72x32xf32>, vector<32x64xf32>, vector<72x64xf32> -> vector<72x64xf32>
    %68 = vector.extract_strided_slice %67 {offsets = [0, 0], sizes = [8, 64], strides = [1, 1]} : vector<72x64xf32> to vector<8x64xf32>
    %69 = vector.extract_strided_slice %67 {offsets = [8, 0], sizes = [8, 64], strides = [1, 1]} : vector<72x64xf32> to vector<8x64xf32>
    %70 = vector.extract_strided_slice %67 {offsets = [16, 0], sizes = [8, 64], strides = [1, 1]} : vector<72x64xf32> to vector<8x64xf32>
    %71 = vector.extract_strided_slice %67 {offsets = [24, 0], sizes = [8, 64], strides = [1, 1]} : vector<72x64xf32> to vector<8x64xf32>
    %72 = vector.extract_strided_slice %67 {offsets = [32, 0], sizes = [8, 64], strides = [1, 1]} : vector<72x64xf32> to vector<8x64xf32>
    %73 = vector.extract_strided_slice %67 {offsets = [40, 0], sizes = [8, 64], strides = [1, 1]} : vector<72x64xf32> to vector<8x64xf32>
    %74 = vector.extract_strided_slice %67 {offsets = [48, 0], sizes = [8, 64], strides = [1, 1]} : vector<72x64xf32> to vector<8x64xf32>
    %75 = vector.extract_strided_slice %67 {offsets = [56, 0], sizes = [8, 64], strides = [1, 1]} : vector<72x64xf32> to vector<8x64xf32>
    %76 = vector.extract_strided_slice %67 {offsets = [64, 0], sizes = [8, 64], strides = [1, 1]} : vector<72x64xf32> to vector<8x64xf32>
    %77 = tpu.concatenate %68, %69, %70, %71, %72, %73, %74, %75, %76 in 1 : vector<8x64xf32>, vector<8x64xf32>, vector<8x64xf32>, vector<8x64xf32>, vector<8x64xf32>, vector<8x64xf32>, vector<8x64xf32>, vector<8x64xf32>, vector<8x64xf32> -> vector<8x576xf32>
    %78 = arith.truncf %77 : vector<8x576xf32> to vector<8x576xbf16>
    %c0_34 = arith.constant 0 : index
    %c0_35 = arith.constant 0 : index
    %79 = vector.load %arg12[%c0_34, %c0_35] : memref<576x256xbf16, #tpu.memory_space<vmem>>, vector<576x256xbf16>
    %cst_36 = arith.constant dense<0.000000e+00> : vector<8x256xf32>
    %80 = tpu.matmul %78, %79, %cst_36 {dimension_numbers = #tpu.dot_dimension_numbers<[1], [0], [0], [1], [0, 0, 1, 1], [], []>} : vector<8x576xbf16>, vector<576x256xbf16>, vector<8x256xf32> -> vector<8x256xf32>
    %c0_37 = arith.constant 0 : index
    %c0_38 = arith.constant 0 : index
    %81 = vector.load %arg13[%c0_37, %c0_38] : memref<8x1xf32, #tpu.memory_space<vmem>>, vector<8x1xf32>
    %82 = vector.broadcast %81 : vector<8x1xf32> to vector<8x256xf32>
    %83 = arith.addf %80, %82 : vector<8x256xf32>
    %cst_39 = arith.constant -1.000000e+00 : f32
    %cst_40 = arith.constant 1.000000e+00 : f32
    %84 = vector.broadcast %cst_39 : f32 to vector<8x256xf32>
    %85 = arith.maximumf %84, %83 : vector<8x256xf32>
    %86 = vector.broadcast %cst_40 : f32 to vector<8x256xf32>
    %87 = arith.minimumf %86, %85 : vector<8x256xf32>
    %c0_41 = arith.constant 0 : index
    %c0_42 = arith.constant 0 : index
    %c0_43 = arith.constant 0 : index
    %88 = vector.load %arg14[%c0_41, %c0_42, %c0_43] : memref<1x8x256xf32, #tpu.memory_space<vmem>>, vector<1x8x256xf32>
    %89 = vector.shape_cast %88 : vector<1x8x256xf32> to vector<8x256xf32>
    %90 = vector.shape_cast %87 : vector<8x256xf32> to vector<1x8x256xf32>
    tpu.vector_store %arg14[%c0_41, %c0_42, %c0_43], %90 {strides = array<i32>} : memref<1x8x256xf32, #tpu.memory_space<vmem>>, vector<1x8x256xf32>,
    return
  }
  func.func @transform_0(%arg0: i32) -> (i32, i32, i32) {
    %c0_i32 = arith.constant 0 : i32
    %c0_i32_0 = arith.constant 0 : i32
    %c0_i32_1 = arith.constant 0 : i32
    return %arg0, %c0_i32, %c0_i32_0 : i32, i32, i32
  }
  func.func @transform_1(%arg0: i32) -> (i32, i32) {
    %c0_i32 = arith.constant 0 : i32
    %c0_i32_0 = arith.constant 0 : i32
    %c0_i32_1 = arith.constant 0 : i32
    return %c0_i32, %c0_i32_0 : i32, i32
  }
  func.func @transform_2(%arg0: i32) -> (i32, i32) {
    %c0_i32 = arith.constant 0 : i32
    %c0_i32_0 = arith.constant 0 : i32
    %c0_i32_1 = arith.constant 0 : i32
    return %c0_i32, %c0_i32_0 : i32, i32
  }
  func.func @transform_3(%arg0: i32) -> (i32, i32) {
    %c0_i32 = arith.constant 0 : i32
    %c0_i32_0 = arith.constant 0 : i32
    %c0_i32_1 = arith.constant 0 : i32
    return %c0_i32, %c0_i32_0 : i32, i32
  }
  func.func @transform_4(%arg0: i32) -> (i32, i32) {
    %c0_i32 = arith.constant 0 : i32
    %c0_i32_0 = arith.constant 0 : i32
    %c0_i32_1 = arith.constant 0 : i32
    return %c0_i32, %c0_i32_0 : i32, i32
  }
  func.func @transform_5(%arg0: i32) -> (i32, i32) {
    %c0_i32 = arith.constant 0 : i32
    %c0_i32_0 = arith.constant 0 : i32
    %c0_i32_1 = arith.constant 0 : i32
    return %c0_i32, %c0_i32_0 : i32, i32
  }
  func.func @transform_6(%arg0: i32) -> (i32, i32) {
    %c0_i32 = arith.constant 0 : i32
    %c0_i32_0 = arith.constant 0 : i32
    %c0_i32_1 = arith.constant 0 : i32
    return %c0_i32, %c0_i32_0 : i32, i32
  }
  func.func @transform_7(%arg0: i32) -> (i32, i32) {
    %c0_i32 = arith.constant 0 : i32
    %c0_i32_0 = arith.constant 0 : i32
    %c0_i32_1 = arith.constant 0 : i32
    return %c0_i32, %c0_i32_0 : i32, i32
  }
  func.func @transform_8(%arg0: i32) -> (i32, i32) {
    %c0_i32 = arith.constant 0 : i32
    %c0_i32_0 = arith.constant 0 : i32
    %c0_i32_1 = arith.constant 0 : i32
    return %c0_i32, %c0_i32_0 : i32, i32
  }
  func.func @transform_9(%arg0: i32) -> (i32, i32) {
    %c0_i32 = arith.constant 0 : i32
    %c0_i32_0 = arith.constant 0 : i32
    %c0_i32_1 = arith.constant 0 : i32
    return %c0_i32, %c0_i32_0 : i32, i32
  }
  func.func @transform_10(%arg0: i32) -> (i32, i32) {
    %c0_i32 = arith.constant 0 : i32
    %c0_i32_0 = arith.constant 0 : i32
    %c0_i32_1 = arith.constant 0 : i32
    return %c0_i32, %c0_i32_0 : i32, i32
  }
  func.func @transform_11(%arg0: i32) -> (i32, i32) {
    %c0_i32 = arith.constant 0 : i32
    %c0_i32_0 = arith.constant 0 : i32
    %c0_i32_1 = arith.constant 0 : i32
    return %c0_i32, %c0_i32_0 : i32, i32
  }
  func.func @transform_12(%arg0: i32) -> (i32, i32) {
    %c0_i32 = arith.constant 0 : i32
    %c0_i32_0 = arith.constant 0 : i32
    %c0_i32_1 = arith.constant 0 : i32
    return %c0_i32, %c0_i32_0 : i32, i32
  }
  func.func @transform_13(%arg0: i32) -> (i32, i32, i32) {
    %c0_i32 = arith.constant 0 : i32
    %c0_i32_0 = arith.constant 0 : i32
    %c0_i32_1 = arith.constant 0 : i32
    return %arg0, %c0_i32, %c0_i32_0 : i32, i32, i32
  }
}

</mosaic_0001>

<bundles_post_ra>
// kernel: vcae_forward.1
= control target key start
LH: loop header
LB: loop body
LE: loop exit
PB: predicated region body
PF: predicated region fallthrough
CT: control target
= control target key end

     0   :  { %s5040_s25 = smov 0   ;;  %s6497_s0 = inlined_call_operand.vmem [shape: f32[2,8,256], index: 0, kind: input, shape index: {}]   ;;  %s6498_s1 = inlined_call_operand.vmem [shape: bf16[256,576], index: 1, kind: input, shape index: {}]   ;;  %s6499_s2 = inlined_call_operand.vmem [shape: f32[32,72], index: 2, kind: input, shape index: {}]   ;;  %s6500_s3 = inlined_call_operand.vmem [shape: f32[32,1], index: 3, kind: input, shape index: {}]   ;;  %s6501_s4 = inlined_call_operand.vmem [shape: f32[360,32], index: 4, kind: input, shape index: {}]   ;;  %s6502_s5 = inlined_call_operand.vmem [shape: f32[576,16], index: 5, kind: input, shape index: {}]   ;;  %s6503_s6 = inlined_call_operand.vmem [shape: f32[40,1], index: 6, kind: input, shape index: {}]   ;;  %s6504_s7 = inlined_call_operand.vmem [shape: f32[16,576], index: 7, kind: input, shape index: {}]   ;;  %s6505_s8 = inlined_call_operand.vmem [shape: f32[32,360], index: 8, kind: input, shape index: {}]   ;;  %s6506_s9 = inlined_call_operand.vmem [shape: f32[32,1], index: 9, kind: input, shape index: {}]   ;;  %s6507_s10 = inlined_call_operand.vmem [shape: f32[72,32], index: 10, kind: input, shape index: {}]   ;;  %s6508_s11 = inlined_call_operand.vmem [shape: bf16[576,256], index: 11, kind: input, shape index: {}]   ;;  %s6509_s12 = inlined_call_operand.vmem [shape: f32[8,1], index: 12, kind: input, shape index: {}]   ;;  %s6510_s13 = inlined_call_operand.vmem [shape: f32[2,8,256], index: 13, kind: output, shape index: {}]  }
   0x1 LB: > { %s3608_s26 = sadd.s32 4294967295, %s4963_s25   ;;  %p3612_p0 = scmp.ge.s32.totalorder %s4963_s25, 1  ;;  %s4963_s25 = sphi %s5040_s25, %s23_s25  }
   0x2   : > { %p387_p1 = scmp.lt.s32.totalorder %s4963_s25, 3 }
   0x4   : > { %p388_p2 = pnand %p3612_p0, %p387_p1 }
   0x5   : > { %v4737_v0 = vld [vmem:[%s6498_s1 + $0x4] ss:$20 sps:$4 sm:$0xff] (!%p388_p2)   ;;  %v4739_v1 = vld [vmem:[%s6498_s1 + $0xc] ss:$20 sps:$4 sm:$0xff] (!%p388_p2)   ;;  %v4742_v3 = vld [vmem:[%s6498_s1 + $0x8] ss:$20 sps:$4 sm:$0xff] (!%p388_p2)  }
   0x6   : > { %391 = sbr.rel (%p388_p2) target bundleno = 2565 (0xa05), region = 72  ;;  %958 = vmatprep.subr.bf16.mxu0 (!%p388_p2), %v4737_v0  ;;  %v4741_v2 = vld [vmem:[%s6498_s1] ss:$20 sps:$4 sm:$0xff] (!%p388_p2)   ;;  %999 = vmatprep.subr.bf16.mxu1 (!%p388_p2), %v4739_v1  ;;  %v4747_v6 = vld [vmem:[%s6498_s1 + $0x28] ss:$20 sps:$4 sm:$0xff] (!%p388_p2)   ;;  %p431_p3 = scmp.lt.s32.totalorder (!%p388_p2), %s3608_s26, 1 }
   0x7   : > { %v4743_v4 = vld [vmem:[%s6498_s1 + $0x2c] ss:$20 sps:$4 sm:$0xff] (!%p388_p2)   ;;  %959 = vmatpush1.bf16.msra.mxu0 (!%p388_p2), %v4741_v2  ;;  %1000 = vmatpush1.bf16.msra.mxu1 (!%p388_p2), %v4742_v3  ;;  %v4745_v5 = vld [vmem:[%s6498_s1 + $0x34] ss:$20 sps:$4 sm:$0xff] (!%p388_p2)   ;;  %v4748_v7 = vld [vmem:[%s6498_s1 + $0x30] ss:$20 sps:$4 sm:$0xff] (!%p388_p2)  }
   0x8   : > { %960 = vmatprep.subr.bf16.mxu0 (!%p388_p2), %v4743_v4  ;;  %1001 = vmatprep.subr.bf16.mxu1 (!%p388_p2), %v4745_v5  ;;  %v4749_v8 = vld [vmem:[%s6498_s1 + $0x54] ss:$20 sps:$4 sm:$0xff] (!%p388_p2)   ;;  %v4751_v9 = vld [vmem:[%s6498_s1 + $0x5c] ss:$20 sps:$4 sm:$0xff] (!%p388_p2)   ;;  %v4754_v11 = vld [vmem:[%s6498_s1 + $0x58] ss:$20 sps:$4 sm:$0xff] (!%p388_p2)  }
   0x9   : > { %v4753_v10 = vld [vmem:[%s6498_s1 + $0x50] ss:$20 sps:$4 sm:$0xff] (!%p388_p2)   ;;  %v4759_v14 = vld [vmem:[%s6498_s1 + $0x78] ss:$20 sps:$4 sm:$0xff] (!%p388_p2)   ;;  %v4760_v15 = vld [vmem:[%s6498_s1 + $0x80] ss:$20 sps:$4 sm:$0xff] (!%p388_p2)  }
   0xa   : > { %v4755_v12 = vld [vmem:[%s6498_s1 + $0x7c] ss:$20 sps:$4 sm:$0xff] (!%p388_p2)   ;;  %v4757_v13 = vld [vmem:[%s6498_s1 + $0x84] ss:$20 sps:$4 sm:$0xff] (!%p388_p2)   ;;  %v4763_v17 = vld [vmem:[%s6498_s1 + $0xac] ss:$20 sps:$4 sm:$0xff] (!%p388_p2)  }
   0xb   : > { %961 = vmatpush1.bf16.msra.mxu0 (!%p388_p2), %v4747_v6  ;;  %1002 = vmatpush1.bf16.msra.mxu1 (!%p388_p2), %v4748_v7  ;;  %v4761_v16 = vld [vmem:[%s6498_s1 + $0xa4] ss:$20 sps:$4 sm:$0xff] (!%p388_p2)   ;;  %v4765_v18 = vld [vmem:[%s6498_s1 + $0xa0] ss:$20 sps:$4 sm:$0xff] (!%p388_p2)   ;;  %v4766_v19 = vld [vmem:[%s6498_s1 + $0xa8] ss:$20 sps:$4 sm:$0xff] (!%p388_p2)  }
   0xc   : > { %962 = vmatprep.subr.bf16.mxu0 (!%p388_p2), %v4749_v8  ;;  %1003 = vmatprep.subr.bf16.mxu1 (!%p388_p2), %v4751_v9  ;;  %v4767_v20 = vld [vmem:[%s6498_s1 + $0xcc] ss:$20 sps:$4 sm:$0xff] (!%p388_p2)   ;;  %v4769_v21 = vld [vmem:[%s6498_s1 + $0xd4] ss:$20 sps:$4 sm:$0xff] (!%p388_p2)   ;;  %v4772_v23 = vld [vmem:[%s6498_s1 + $0xd0] ss:$20 sps:$4 sm:$0xff] (!%p388_p2)  }
   0xd   : > { %v4771_v22 = vld [vmem:[%s6498_s1 + $0xc8] ss:$20 sps:$4 sm:$0xff]   ;;  %v4777_v26 = vld [vmem:[%s6498_s1 + $0xf0] ss:$20 sps:$4 sm:$0xff]   ;;  %v4778_v27 = vld [vmem:[%s6498_s1 + $0xf8] ss:$20 sps:$4 sm:$0xff]  }
   0xe   : > { %v4773_v24 = vld [vmem:[%s6498_s1 + $0xf4] ss:$20 sps:$4 sm:$0xff]   ;;  %v4775_v25 = vld [vmem:[%s6498_s1 + $0xfc] ss:$20 sps:$4 sm:$0xff]   ;;  %v4781_v29 = vld [vmem:[%s6498_s1 + $0x124] ss:$20 sps:$4 sm:$0xff]  }
   0xf   : > { %963 = vmatpush1.bf16.msra.mxu0 %v4753_v10  ;;  %1004 = vmatpush1.bf16.msra.mxu1 %v4754_v11  ;;  %v4779_v28 = vld [vmem:[%s6498_s1 + $0x11c] ss:$20 sps:$4 sm:$0xff]   ;;  %v4783_v30 = vld [vmem:[%s6498_s1 + $0x118] ss:$20 sps:$4 sm:$0xff]   ;;  %v4784_v31 = vld [vmem:[%s6498_s1 + $0x120] ss:$20 sps:$4 sm:$0xff]  }
  0x10   : > { %964 = vmatprep.subr.bf16.mxu0 %v4755_v12  ;;  %1005 = vmatprep.subr.bf16.mxu1 %v4757_v13  ;;  %v4785_v32 = vld [vmem:[%s6498_s1 + $0x144] ss:$20 sps:$4 sm:$0xff]   ;;  %v4787_v33 = vld [vmem:[%s6498_s1 + $0x14c] ss:$20 sps:$4 sm:$0xff]   ;;  %v4790_v35 = vld [vmem:[%s6498_s1 + $0x148] ss:$20 sps:$4 sm:$0xff]  }
  0x11   : > { %v4789_v34 = vld [vmem:[%s6498_s1 + $0x140] ss:$20 sps:$4 sm:$0xff]   ;;  %s6512_s26 = smov (!%p431_p3, %s3608_s26), 1  ;;  %v4795_v38 = vld [vmem:[%s6498_s1 + $0x168] ss:$20 sps:$4 sm:$0xff]   ;;  %s4965_s18 = smov 64  }
  0x12   : > { %v4791_v36 = vld [vmem:[%s6498_s1 + $0x16c] ss:$20 sps:$4 sm:$0xff]   ;;  %v4793_v37 = vld [vmem:[%s6498_s1 + $0x174] ss:$20 sps:$4 sm:$0xff]   ;;  %v4796_v39 = vld [vmem:[%s6498_s1 + $0x170] ss:$20 sps:$4 sm:$0xff]  }
  0x13   : > { %965 = vmatpush1.bf16.msra.mxu0 %v4759_v14  ;;  %1006 = vmatpush1.bf16.msra.mxu1 %v4760_v15  ;;  %v4797_v40 = vld [vmem:[%s6498_s1 + $0x194] ss:$20 sps:$4 sm:$0xff]   ;;  %s3869_s17 = sshll.u32 %s6512_s26, 4  ;;  %v4799_v41 = vld [vmem:[%s6498_s1 + $0x19c] ss:$20 sps:$4 sm:$0xff]   ;;  %vm1124_vm0 = vcmask 588800  }
  0x14   : > { %966 = vmatprep.subr.bf16.mxu0 %v4761_v16  ;;  %1007 = vmatprep.subr.bf16.mxu1 %v4763_v17  ;;  %v4801_v42 = vld [vmem:[%s6498_s1 + $0x190] ss:$20 sps:$4 sm:$0xff]   ;;  %v4802_v43 = vld [vmem:[%s6498_s1 + $0x198] ss:$20 sps:$4 sm:$0xff]   ;;  %s5192_s28 = scalar_lea.vmem %s6497_s0, %s3869_s17  ;;  %v4808_v48 = vld [vmem:[%s6498_s1 + $0x1c0] ss:$20 sps:$4 sm:$0xff]   ;;  %s440_s22 = scalar_lea.vmem %s6510_s13, %s3869_s17 }
  0x15   : > { %v4803_v44 = vld [vmem:[%s6498_s1 + $0x1bc] ss:$20 sps:$4 sm:$0xff]   ;;  %v4805_v45 = vld [vmem:[%s6498_s1 + $0x1c4] ss:$20 sps:$4 sm:$0xff]   ;;  %v443_v47 = vld [vmem:[%s5192_s28 + $0x8] sm:$0xff]  ;;  %vm4968_vm1 = vmmov 0  }
  0x16   : > { %v4807_v46 = vld [vmem:[%s6498_s1 + $0x1b8] ss:$20 sps:$4 sm:$0xff]   ;;  %v445_v49 = vpack.c.bf16 %v443_v47, %v443_v47  ;;  %v4813_v52 = vld [vmem:[%s6498_s1 + $0x1e0] ss:$20 sps:$4 sm:$0xff]   ;;  %v4814_v53 = vld [vmem:[%s6498_s1 + $0x1e8] ss:$20 sps:$4 sm:$0xff]  }
  0x17   : > { %967 = vmatpush1.bf16.msra.mxu0 %v4765_v18  ;;  %1008 = vmatpush1.bf16.msra.mxu1 %v4766_v19  ;;  %v4809_v50 = vld [vmem:[%s6498_s1 + $0x1e4] ss:$20 sps:$4 sm:$0xff]   ;;  %v4811_v51 = vld [vmem:[%s6498_s1 + $0x1ec] ss:$20 sps:$4 sm:$0xff]   ;;  %v4817_v55 = vld [vmem:[%s6498_s1 + $0x214] ss:$20 sps:$4 sm:$0xff]  }
  0x18   : > { %968 = vmatprep.subr.bf16.mxu0 %v4767_v20  ;;  %1009 = vmatprep.subr.bf16.mxu1 %v4769_v21  ;;  %v4815_v54 = vld [vmem:[%s6498_s1 + $0x20c] ss:$20 sps:$4 sm:$0xff]   ;;  %v4819_v56 = vld [vmem:[%s6498_s1 + $0x208] ss:$20 sps:$4 sm:$0xff]   ;;  %v4820_v57 = vld [vmem:[%s6498_s1 + $0x210] ss:$20 sps:$4 sm:$0xff]  }
  0x19   : > { %990 = vmatprep.mubr.bf16.mxu0 %v445_v49  ;;  %1031 = vmatprep.mubr.bf16.mxu1 %v445_v49  ;;  %v4821_v58 = vld [vmem:[%s6498_s1 + $0x234] ss:$20 sps:$4 sm:$0xff]   ;;  %v4823_v59 = vld [vmem:[%s6498_s1 + $0x23c] ss:$20 sps:$4 sm:$0xff]   ;;  %v4826_v61 = vld [vmem:[%s6498_s1 + $0x238] ss:$20 sps:$4 sm:$0xff]  }
  0x1a   : > { %v4825_v60 = vld [vmem:[%s6498_s1 + $0x230] ss:$20 sps:$4 sm:$0xff]   ;;  %v4831_v0 = vld [vmem:[%s6498_s1 + $0x258] ss:$20 sps:$4 sm:$0xff]   ;;  %v4832_v1 = vld [vmem:[%s6498_s1 + $0x260] ss:$20 sps:$4 sm:$0xff]  }
  0x1b   : > { %969 = vmatpush1.bf16.msra.mxu0 %v4771_v22  ;;  %1010 = vmatpush1.bf16.msra.mxu1 %v4772_v23  ;;  %v4827_v62 = vld [vmem:[%s6498_s1 + $0x25c] ss:$20 sps:$4 sm:$0xff]   ;;  %v4829_v63 = vld [vmem:[%s6498_s1 + $0x264] ss:$20 sps:$4 sm:$0xff]   ;;  %v4837_v8 = vld [vmem:[%s6498_s1 + $0x1a0] ss:$20 sps:$4 sm:$0xff]  }
  0x1c   : > { %970 = vmatprep.subr.bf16.mxu0 %v4773_v24  ;;  %1011 = vmatprep.subr.bf16.mxu1 %v4775_v25  ;;  %v442_v2 = vld [vmem:[%s5192_s28] sm:$0xff]  ;;  %v4835_v6 = vld [vmem:[%s6498_s1 + $0x178] ss:$20 sps:$4 sm:$0xff]   ;;  %v4839_v10 = vld [vmem:[%s6498_s1 + $0x1c8] ss:$20 sps:$4 sm:$0xff]   ;;  %vm1275_vm2 = vcmask 261120  }
  0x1d   : > { %v4833_v3 = vld [vmem:[%s6498_s1 + $0x150] ss:$20 sps:$4 sm:$0xff]   ;;  %v444_v5 = vpack.c.bf16 %v442_v2, %v442_v2  ;;  %v4836_v7 = vld [vmem:[%s6498_s1 + $0x38] ss:$20 sps:$4 sm:$0xff]   ;;  %v4838_v9 = vld [vmem:[%s6498_s1 + $0x60] ss:$20 sps:$4 sm:$0xff]  }
  0x1e   : > { %v4834_v4 = vld [vmem:[%s6498_s1 + $0x10] ss:$20 sps:$4 sm:$0xff]   ;;  %v4840_v11 = vld [vmem:[%s6498_s1 + $0x88] ss:$20 sps:$4 sm:$0xff]   ;;  %v4843_v14 = vld [vmem:[%s6498_s1 + $0x218] ss:$20 sps:$4 sm:$0xff]  }
  0x1f   : > { %971 = vmatpush1.bf16.msra.mxu0 %v4777_v26  ;;  %1012 = vmatpush1.bf16.msra.mxu1 %v4778_v27  ;;  %v4841_v12 = vld [vmem:[%s6498_s1 + $0x1f0] ss:$20 sps:$4 sm:$0xff]   ;;  %v4844_v15 = vld [vmem:[%s6498_s1 + $0xd8] ss:$20 sps:$4 sm:$0xff]   ;;  %v4845_v16 = vld [vmem:[%s6498_s1 + $0x240] ss:$20 sps:$4 sm:$0xff]  }
  0x20   : > { %972 = vmatprep.subr.bf16.mxu0 %v4779_v28  ;;  %1013 = vmatprep.subr.bf16.mxu1 %v4781_v29  ;;  %v4842_v13 = vld [vmem:[%s6498_s1 + $0xb0] ss:$20 sps:$4 sm:$0xff]   ;;  %v4846_v17 = vld [vmem:[%s6498_s1 + $0x100] ss:$20 sps:$4 sm:$0xff]   ;;  %v4847_v18 = vld [vmem:[%s6498_s1 + $0x268] ss:$20 sps:$4 sm:$0xff]  }
  0x21   : > { %v4848_v19 = vld [vmem:[%s6498_s1 + $0x128] ss:$20 sps:$4 sm:$0xff]   ;;  %v1096_v28 = vld [vmem:[%s6499_s2] sm:$0xff]  ;;  %vm1781_vm3 = vcmask 523264   ;;  %vm2209_vm4 = vcmask 130048   ;;  %vm2621_vm5 = vcmask 850944  }
  0x22   : > { %v1101_v29 = vld [vmem:[%s6500_s3 + $0x8] sm:$0xff] }
  0x23   : > { %973 = vmatpush1.bf16.msra.mxu0 %v4783_v30  ;;  %1014 = vmatpush1.bf16.msra.mxu1 %v4784_v31  ;;  %v1100_v30 = vld [vmem:[%s6500_s3] sm:$0xff]  ;;  %v4966_v31 = vmov 0   ;;  %v1097_v47 = vld [vmem:[%s6499_s2 + $0x8] sm:$0xff] }
  0x24   : > { %974 = vmatprep.subr.bf16.mxu0 %v4785_v32  ;;  %1015 = vmatprep.subr.bf16.mxu1 %v4787_v33  ;;  %v1102_v32 = vld [vmem:[%s6500_s3 + $0x10] sm:$0xff]  ;;  %v1103_v33 = vld [vmem:[%s6500_s3 + $0x18] sm:$0xff] }
  0x25   : > { %4626 = vset.pattern.permute.xlu1 %v4966_v31  ;;  %4625 = vset.pattern.permute.xlu0 %v4966_v31 }
  0x27   : > { %975 = vmatpush1.bf16.msra.mxu0 %v4789_v34  ;;  %1016 = vmatpush1.bf16.msra.mxu1 %v4790_v35 }
  0x28   : > { %976 = vmatprep.subr.bf16.mxu0 %v4791_v36  ;;  %1017 = vmatprep.subr.bf16.mxu1 %v4793_v37 }
  0x2b   : > { %977 = vmatpush1.bf16.msra.mxu0 %v4795_v38  ;;  %1018 = vmatpush1.bf16.msra.mxu1 %v4796_v39 }
  0x2c   : > { %978 = vmatprep.subr.bf16.mxu0 %v4797_v40  ;;  %1019 = vmatprep.subr.bf16.mxu1 %v4799_v41 }
  0x2f   : > { %979 = vmatpush1.bf16.msra.mxu0 %v4801_v42  ;;  %1020 = vmatpush1.bf16.msra.mxu1 %v4802_v43 }
  0x30   : > { %980 = vmatprep.subr.bf16.mxu0 %v4803_v44  ;;  %1021 = vmatprep.subr.bf16.mxu1 %v4805_v45 }
  0x33   : > { %981 = vmatpush1.bf16.msra.mxu0 %v4807_v46  ;;  %1022 = vmatpush1.bf16.msra.mxu1 %v4808_v48  ;;  %v1098_v48 = vld [vmem:[%s6499_s2 + $0x10] sm:$0xff] }
  0x34   : > { %982 = vmatprep.subr.bf16.mxu0 %v4809_v50  ;;  %1023 = vmatprep.subr.bf16.mxu1 %v4811_v51  ;;  %v4967_v50 = vmov 0.0|0.0   ;;  %v4969_v51 = vmov 0.0  }
  0x37   : > { %983 = vmatpush1.bf16.msra.mxu0 %v4813_v52  ;;  %1024 = vmatpush1.bf16.msra.mxu1 %v4814_v53 }
  0x38   : > { %984 = vmatprep.subr.bf16.mxu0 %v4815_v54  ;;  %1025 = vmatprep.subr.bf16.mxu1 %v4817_v55 }
  0x3b   : > { %985 = vmatpush1.bf16.msra.mxu0 %v4819_v56  ;;  %1026 = vmatpush1.bf16.msra.mxu1 %v4820_v57 }
  0x3c   : > { %986 = vmatprep.subr.bf16.mxu0 %v4821_v58  ;;  %1027 = vmatprep.subr.bf16.mxu1 %v4823_v59 }
  0x3f   : > { %987 = vmatpush1.bf16.msra.mxu0 %v4825_v60  ;;  %1028 = vmatpush1.bf16.msra.mxu1 %v4826_v61 }
  0x40   : > { %988 = vmatprep.subr.bf16.mxu0 %v4827_v62  ;;  %1029 = vmatprep.subr.bf16.mxu1 %v4829_v63 }
  0x43   : > { %989 = vmatpush1.bf16.msra.mxu0 %v4831_v0  ;;  %1030 = vmatpush1.bf16.msra.mxu1 %v4832_v1 }
  0x44   : > { %3871 = vmatprep.subr.bf16.mxu0 %v4833_v3 }
  0x46   : > { %991 = vmatmul.mubr.bf16.vlgmr.msra.gmra.mrb[0].mxu0 %v444_v5  ;;  %1032 = vmatmul.mubr.bf16.vlgmr.msra.gmra.mrb[0].mxu1 %v444_v5 }
  0x47   : > { %3872 = vmatpush3.bf16.msra.mxu0 %v4834_v4  ;;  %1072 = vmatprep.mubr.bf16.mxu0 %v445_v49  ;;  %v1099_v49 = vld [vmem:[%s6499_s2 + $0x18] sm:$0xff] }
  0x48   : > { %3873 = vmatprep.subr.bf16.mxu0 %v4835_v6  ;;  %4161 = vmatprep.mubr.msk.f32.mxu1 %vm1124_vm0, %v1096_v28  ;;  %v1230_v6 = vld [vmem:[%s6501_s4] sm:$0xff]  ;;  %v1241_v28 = vld [vmem:[%s6501_s4 + $0x58] sm:$0xff] }
  0x4b   : > { %3874 = vmatpush3.bf16.msra.mxu0 %v4836_v7  ;;  %v1247_v7 = vld [vmem:[%s6501_s4 + $0x88] sm:$0xff] }
  0x4c   : > { %3875 = vmatprep.subr.bf16.mxu0 %v4837_v8  ;;  %v1231_v8 = vld [vmem:[%s6501_s4 + $0x8] sm:$0xff] }
  0x4f   : > { %3876 = vmatpush3.bf16.msra.mxu0 %v4838_v9  ;;  %v1248_v9 = vld [vmem:[%s6501_s4 + $0x90] sm:$0xff] }
  0x50   : > { %3877 = vmatprep.subr.bf16.mxu0 %v4839_v10  ;;  %v1232_v10 = vld [vmem:[%s6501_s4 + $0x10] sm:$0xff] }
  0x53   : > { %3878 = vmatpush3.bf16.msra.mxu0 %v4840_v11  ;;  %v1249_v11 = vld [vmem:[%s6501_s4 + $0x98] sm:$0xff] }
  0x54   : > { %3879 = vmatprep.subr.bf16.mxu0 %v4841_v12  ;;  %v1233_v12 = vld [vmem:[%s6501_s4 + $0x18] sm:$0xff] }
  0x57   : > { %3880 = vmatpush3.bf16.msra.mxu0 %v4842_v13  ;;  %v1250_v13 = vld [vmem:[%s6501_s4 + $0xa0] sm:$0xff] }
  0x58   : > { %3881 = vmatprep.subr.bf16.mxu0 %v4843_v14  ;;  %v1234_v14 = vld [vmem:[%s6501_s4 + $0x20] sm:$0xff] }
  0x5b   : > { %3882 = vmatpush3.bf16.msra.mxu0 %v4844_v15  ;;  %v1251_v15 = vld [vmem:[%s6501_s4 + $0xa8] sm:$0xff] }
  0x5c   : > { %3883 = vmatprep.subr.bf16.mxu0 %v4845_v16  ;;  %v1235_v16 = vld [vmem:[%s6501_s4 + $0x28] sm:$0xff] }
  0x5f   : > { %3884 = vmatpush3.bf16.msra.mxu0 %v4846_v17  ;;  %v1252_v17 = vld [vmem:[%s6501_s4 + $0xb0] sm:$0xff] }
  0x60   : > { %3885 = vmatprep.subr.bf16.mxu0 %v4847_v18  ;;  %v1236_v18 = vld [vmem:[%s6501_s4 + $0x30] sm:$0xff] }
  0x63   : > { %3886 = vmatpush3.bf16.msra.mxu0 %v4848_v19  ;;  %v1253_v19 = vld [vmem:[%s6501_s4 + $0xb8] sm:$0xff] }
  0x64   : > { %4443 = vmatprep.subr.bf16.mxu0 %v4967_v50 }
  0x66   : > { %1073 = vmatmul.mubr.bf16.vlgmr.msra.gmra.mrb[4].mxu0 %v444_v5 }
  0x67   : > { %4175 = vmatprep.mubr.msk.f32.mxu0 %vm4968_vm1, %v4969_v51 }
 0x119   : > { %v992_v20 = vpop.f32.mrb[0].mxu0  ;;  %v1033_v21 = vpop.f32.mrb[0].mxu1 }
 0x11a   : > { %1089 = vrot.lane.b32.xlu1 %v1033_v21, %s4965_s18  ;;  %1081 = vrot.lane.b32.xlu0 %v992_v20, %s4965_s18  ;;  %v994_v22 = vpop.f32.mrb[1].mxu0  ;;  %v1035_v23 = vpop.f32.mrb[1].mxu1 }
 0x11b   : > { %v996_v24 = vpop.f32.mrb[2].mxu0  ;;  %v1037_v25 = vpop.f32.mrb[2].mxu1 }
 0x11c   : > { %v997_v26 = vpop.f32.mrb[3].mxu0  ;;  %v1038_v27 = vpop.f32.mrb[3].mxu1  ;;  %v1239_v24 = vld [vmem:[%s6501_s4 + $0x48] sm:$0xff]  ;;  %v1256_v25 = vld [vmem:[%s6501_s4 + $0xd0] sm:$0xff] }
 0x11d   : > { %v1240_v26 = vld [vmem:[%s6501_s4 + $0x50] sm:$0xff]  ;;  %v1257_v27 = vld [vmem:[%s6501_s4 + $0xd8] sm:$0xff] }
 0x11e   : > { %1093 = vrot.lane.b32.xlu1 %v1035_v23, %s4965_s18  ;;  %1085 = vrot.lane.b32.xlu0 %v994_v22, %s4965_s18 }
 0x122   : > { %1111 = vperm.xlu1 %4626, %v1101_v29   ;;  %1106 = vperm.xlu0 %4625, %v1100_v30   ;;  %v1258_v29 = vld [vmem:[%s6501_s4 + $0xe0] sm:$0xff] }
 0x123   : > { %v1242_v30 = vld [vmem:[%s6501_s4 + $0x60] sm:$0xff] }
 0x126   : > { %1116 = vperm.xlu1 %4626, %v1102_v32   ;;  %1121 = vperm.xlu0 %4625, %v1103_v33   ;;  %v1259_v32 = vld [vmem:[%s6501_s4 + $0xe8] sm:$0xff] }
 0x127   : > { %v1243_v33 = vld [vmem:[%s6501_s4 + $0x68] sm:$0xff] }
 0x139   : > { %v3887_v34 = vpop.f32.mrb[4].mxu0 }
 0x13a   : > { %v3888_v35 = vpop.f32.mrb[5].mxu0 }
 0x13b   : > { %v3889_v36 = vadd.f32 %v3888_v35, %v3887_v34  ;;  %v3890_v37 = vpop.f32.mrb[6].mxu0  ;;  %v1260_v34 = vld [vmem:[%s6501_s4 + $0xf0] sm:$0xff] }
 0x13c   : > { %v3891_v38 = vpop.f32.mrb[7].mxu0  ;;  %v1244_v35 = vld [vmem:[%s6501_s4 + $0x70] sm:$0xff]  ;;  %v1245_v37 = vld [vmem:[%s6501_s4 + $0x78] sm:$0xff] }
 0x13d   : > { %v1262_v38 = vld [vmem:[%s6501_s4 + $0x100] sm:$0xff] }
 0x18c   : > { %v1082_v39 = vpop.permute.xlu0 %1081  ;;  %v1090_v41 = vpop.permute.xlu1 %1089 }
 0x18d   : > { %v4427_v40 = vpack.c.bf16 %v1082_v39, %v992_v20  ;;  %v4435_v44 = vpack.c.bf16 %v1090_v41, %v1033_v21  ;;  %v1237_v20 = vld [vmem:[%s6501_s4 + $0x38] sm:$0xff]  ;;  %v1254_v21 = vld [vmem:[%s6501_s4 + $0xc0] sm:$0xff]  ;;  %v1264_v41 = vld [vmem:[%s6501_s4 + $0x110] sm:$0xff] }
 0x18e   : > { %v1246_v39 = vld [vmem:[%s6501_s4 + $0x80] sm:$0xff] }
 0x18f   : > { %4428 = vmatprep.subr.bf16.mxu1 %v4427_v40 }
 0x190   : > { %4430 = vmatpush3.bf16.msra.mxu1 %v4427_v40  ;;  %v1086_v42 = vpop.permute.xlu0 %1085  ;;  %v1094_v45 = vpop.permute.xlu1 %1093  ;;  %v1263_v40 = vld [vmem:[%s6501_s4 + $0x108] sm:$0xff] }
 0x191   : > { %v4431_v43 = vpack.c.bf16 %v1086_v42, %v994_v22  ;;  %v4439_v46 = vpack.c.bf16 %v1094_v45, %v1035_v23  ;;  %v1238_v22 = vld [vmem:[%s6501_s4 + $0x40] sm:$0xff]  ;;  %v1255_v23 = vld [vmem:[%s6501_s4 + $0xc8] sm:$0xff]  ;;  %v1265_v42 = vld [vmem:[%s6501_s4 + $0x118] sm:$0xff] }
 0x192   : > { %v1268_v45 = vld [vmem:[%s6501_s4 + $0x130] sm:$0xff] }
 0x193   : > { %4432 = vmatprep.subr.bf16.mxu1 %v4431_v43 }
 0x194   : > { %4434 = vmatpush3.bf16.msra.mxu1 %v4431_v43  ;;  %v1266_v43 = vld [vmem:[%s6501_s4 + $0x120] sm:$0xff] }
 0x195   : > { %4436 = vmatprep.subr.bf16.mxu1 %v4435_v44 }
 0x198   : > { %4438 = vmatpush3.bf16.msra.mxu1 %v4435_v44  ;;  %v1267_v44 = vld [vmem:[%s6501_s4 + $0x128] sm:$0xff] }
 0x199   : > { %4440 = vmatprep.subr.bf16.mxu1 %v4439_v46 }
 0x19c   : > { %4442 = vmatpush3.bf16.msra.mxu1 %v4439_v46  ;;  %v1269_v46 = vld [vmem:[%s6501_s4 + $0x138] sm:$0xff] }
 0x19d   : > { %4159 = vmatprep.subr.mxu1 %v3889_v36 }
 0x1a0   : > { %4160 = vmatpush3.msra.mxu1 %v3889_v36  ;;  %v1261_v36 = vld [vmem:[%s6501_s4 + $0xf8] sm:$0xff] }
 0x1a1   : > { %4162 = vmatmul.mubr.msk.f32.vlgmr.msra.gmra.mrb[4].mxu1 %vm1124_vm0, %v1097_v47  ;;  %4598 = vmatprep.subr.bf16.mxu1 %v4967_v50  ;;  %v1107_v52 = vpop.permute.xlu0 %1106  ;;  %v1112_v53 = vpop.permute.xlu1 %1111  ;;  %v1270_v47 = vld [vmem:[%s6501_s4 + $0x140] sm:$0xff] }
 0x1a2   : > { %4164 = vmatprep.mubr.msk.f32.mxu1 %vm1124_vm0, %v1098_v48  ;;  %v1271_v48 = vld [vmem:[%s6501_s4 + $0x148] sm:$0xff] }
 0x1a5   : > { %4165 = vmatmul.mubr.msk.f32.gmra.mrb[6].mxu1 %vm1124_vm0, %v1099_v49  ;;  %v1122_v59 = vpop.permute.xlu0 %1121  ;;  %v1117_v62 = vpop.permute.xlu1 %1116  ;;  %v1272_v49 = vld [vmem:[%s6501_s4 + $0x150] sm:$0xff] }
 0x1a6   : > { %4226 = vmatprep.mubr.msk.f32.mxu1 %vm4968_vm1, %v4969_v51 }
 0x274   : > { %v4163_v54 = vpop.f32.mrb[4].mxu1 }
 0x275   : > { %v1209_v55 = vadd.f32 %v4163_v54, %v1112_v53  ;;  %v1203_v56 = vpop.f32.mrb[5].mxu1  ;;  %v1274_v53 = vld [vmem:[%s6501_s4 + $0x160] sm:$0xff] }
 0x276   : > { %v1204_v57 = vadd.f32 %v1203_v56, %v1107_v52  ;;  %v1273_v52 = vld [vmem:[%s6501_s4 + $0x158] sm:$0xff]  ;;  %v1818_v54 = vld [vmem:[%s6502_s5 + $0x80] sm:$0xff] }
 0x277   : > { %v3702_v58 = vclamps-f32 %v1209_v55, 1.0  ;;  %v1819_v55 = vld [vmem:[%s6502_s5 + $0x88] sm:$0xff]  ;;  %v1802_v56 = vld [vmem:[%s6502_s5] sm:$0xff] }
 0x278   : > { %v3701_v60 = vclamps-f32 %v1204_v57, 1.0  ;;  %v4166_v61 = vpop.f32.mrb[6].mxu1  ;;  %v4449_v57 = vpack.c.bf16 %v1819_v55, %v1818_v54 }
 0x279   : > { %v1219_v63 = vadd.f32 %v4166_v61, %v1122_v59  ;;  %v1213_v0 = vpop.f32.mrb[7].mxu1  ;;  %v1820_v59 = vld [vmem:[%s6502_s5 + $0x90] sm:$0xff] }
 0x27a   : > { %v4444_v1 = vpack.c.bf16 %v3702_v58, %v3701_v60  ;;  %v1214_v2 = vadd.f32 %v1213_v0, %v1117_v62  ;;  %v1803_v58 = vld [vmem:[%s6502_s5 + $0x8] sm:$0xff]  ;;  %v1821_v60 = vld [vmem:[%s6502_s5 + $0x98] sm:$0xff] }
 0x27b   : > { %v3704_v3 = vclamps-f32 %v1219_v63, 1.0  ;;  %v4451_v61 = vpack.c.bf16 %v1803_v58, %v1802_v56  ;;  %v4453_v62 = vpack.c.bf16 %v1821_v60, %v1820_v59  ;;  %v1804_v63 = vld [vmem:[%s6502_s5 + $0x10] sm:$0xff]  ;;  %v1805_v0 = vld [vmem:[%s6502_s5 + $0x18] sm:$0xff] }
 0x27c   : > { %v3703_v4 = vclamps-f32 %v1214_v2, 1.0  ;;  %4445 = vmatpush3.bf16.msra.mxu0 %v4444_v1  ;;  %4600 = vmatpush3.bf16.msra.mxu1 %v4444_v1  ;;  %v1822_v1 = vld [vmem:[%s6502_s5 + $0xa0] sm:$0xff]  ;;  %v1823_v2 = vld [vmem:[%s6502_s5 + $0xa8] sm:$0xff] }
 0x27d   : > { %4446 = vmatprep.subr.bf16.mxu0 %v4967_v50  ;;  %4599 = vmatprep.subr.bf16.mxu1 %v4967_v50 }
 0x27e   : > { %v4447_v5 = vpack.c.bf16 %v3704_v3, %v3703_v4  ;;  %v4455_v3 = vpack.c.bf16 %v1805_v0, %v1804_v63  ;;  %v4457_v4 = vpack.c.bf16 %v1823_v2, %v1822_v1 }
 0x280   : > { %4448 = vmatpush3.bf16.msra.mxu0 %v4447_v5  ;;  %4601 = vmatpush3.bf16.msra.mxu1 %v4447_v5  ;;  %v1806_v5 = vld [vmem:[%s6502_s5 + $0x20] sm:$0xff] }
 0x281   : > { %4450 = vmatprep.subr.bf16.mxu0 %v4449_v57 }
 0x283   : > { %4176 = vmatmul.mubr.msk.f32.vlgmr.msra.gmra.mrb[8].mxu0 %vm1275_vm2, %v1230_v6  ;;  %4227 = vmatmul.mubr.msk.f32.vlgmr.msra.gmra.mrb[8].mxu1 %vm1275_vm2, %v1247_v7  ;;  %v1807_v6 = vld [vmem:[%s6502_s5 + $0x28] sm:$0xff]  ;;  %v1824_v7 = vld [vmem:[%s6502_s5 + $0xb0] sm:$0xff] }
 0x284   : > { %4178 = vmatprep.mubr.msk.f32.mxu0 %vm4968_vm1, %v4969_v51  ;;  %4229 = vmatprep.mubr.msk.f32.mxu1 %vm4968_vm1, %v4969_v51 }
 0x285   : > { %4452 = vmatpush3.bf16.msra.mxu0 %v4451_v61 }
 0x286   : > { %4454 = vmatprep.subr.bf16.mxu0 %v4453_v62 }
 0x287   : > { %4179 = vmatmul.mubr.msk.f32.gmra.mrb[10].mxu0 %vm1275_vm2, %v1231_v8  ;;  %4230 = vmatmul.mubr.msk.f32.gmra.mrb[10].mxu1 %vm1275_vm2, %v1248_v9  ;;  %v1825_v8 = vld [vmem:[%s6502_s5 + $0xb8] sm:$0xff]  ;;  %v4459_v9 = vpack.c.bf16 %v1807_v6, %v1806_v5 }
 0x288   : > { %4181 = vmatprep.mubr.msk.f32.mxu0 %vm4968_vm1, %v4969_v51  ;;  %4232 = vmatprep.mubr.msk.f32.mxu1 %vm4968_vm1, %v4969_v51 }
 0x289   : > { %4456 = vmatpush3.bf16.msra.mxu0 %v4455_v3 }
 0x28a   : > { %4458 = vmatprep.subr.bf16.mxu0 %v4457_v4 }
 0x28b   : > { %4182 = vmatmul.mubr.msk.f32.gmra.mrb[12].mxu0 %vm1275_vm2, %v1232_v10  ;;  %4233 = vmatmul.mubr.msk.f32.gmra.mrb[12].mxu1 %vm1275_vm2, %v1249_v11  ;;  %v4461_v10 = vpack.c.bf16 %v1825_v8, %v1824_v7  ;;  %v1808_v11 = vld [vmem:[%s6502_s5 + $0x30] sm:$0xff] }
 0x28c   : > { %4184 = vmatprep.mubr.msk.f32.mxu0 %vm4968_vm1, %v4969_v51  ;;  %4235 = vmatprep.mubr.msk.f32.mxu1 %vm4968_vm1, %v4969_v51 }
 0x28d   : > { %4460 = vmatpush3.bf16.msra.mxu0 %v4459_v9 }
 0x28e   : > { %4462 = vmatprep.subr.bf16.mxu0 %v4461_v10 }
 0x28f   : > { %4185 = vmatmul.mubr.msk.f32.gmra.mrb[14].mxu0 %vm1275_vm2, %v1233_v12  ;;  %4236 = vmatmul.mubr.msk.f32.gmra.mrb[14].mxu1 %vm1275_vm2, %v1250_v13  ;;  %v1809_v12 = vld [vmem:[%s6502_s5 + $0x38] sm:$0xff]  ;;  %v1826_v13 = vld [vmem:[%s6502_s5 + $0xc0] sm:$0xff] }
 0x290   : > { %4187 = vmatprep.mubr.msk.f32.mxu0 %vm4968_vm1, %v4969_v51  ;;  %4238 = vmatprep.mubr.msk.f32.mxu1 %vm4968_vm1, %v4969_v51 }
 0x293   : > { %4188 = vmatmul.mubr.msk.f32.gmra.mrb[16].mxu0 %vm1275_vm2, %v1234_v14  ;;  %4239 = vmatmul.mubr.msk.f32.gmra.mrb[16].mxu1 %vm1275_vm2, %v1251_v15  ;;  %v1827_v14 = vld [vmem:[%s6502_s5 + $0xc8] sm:$0xff]  ;;  %v4463_v15 = vpack.c.bf16 %v1809_v12, %v1808_v11 }
 0x294   : > { %4190 = vmatprep.mubr.msk.f32.mxu0 %vm4968_vm1, %v4969_v51  ;;  %4241 = vmatprep.mubr.msk.f32.mxu1 %vm4968_vm1, %v4969_v51 }
 0x295   : > { %4464 = vmatpush3.bf16.msra.mxu0 %v4463_v15 }
 0x297   : > { %4191 = vmatmul.mubr.msk.f32.gmra.mrb[18].mxu0 %vm1275_vm2, %v1235_v16  ;;  %4242 = vmatmul.mubr.msk.f32.gmra.mrb[18].mxu1 %vm1275_vm2, %v1252_v17  ;;  %v4465_v16 = vpack.c.bf16 %v1827_v14, %v1826_v13  ;;  %v1810_v17 = vld [vmem:[%s6502_s5 + $0x40] sm:$0xff] }
 0x298   : > { %4193 = vmatprep.mubr.msk.f32.mxu0 %vm4968_vm1, %v4969_v51  ;;  %4244 = vmatprep.mubr.msk.f32.mxu1 %vm4968_vm1, %v4969_v51 }
 0x299   : > { %4466 = vmatprep.subr.bf16.mxu0 %v4465_v16 }
 0x29b   : > { %4194 = vmatmul.mubr.msk.f32.gmra.mrb[20].mxu0 %vm1275_vm2, %v1236_v18  ;;  %4245 = vmatmul.mubr.msk.f32.gmra.mrb[20].mxu1 %vm1275_vm2, %v1253_v19  ;;  %v1811_v18 = vld [vmem:[%s6502_s5 + $0x48] sm:$0xff]  ;;  %v1828_v19 = vld [vmem:[%s6502_s5 + $0xd0] sm:$0xff] }
 0x29c   : > { %4196 = vmatprep.mubr.msk.f32.mxu0 %vm4968_vm1, %v4969_v51  ;;  %4247 = vmatprep.mubr.msk.f32.mxu1 %vm4968_vm1, %v4969_v51 }
 0x29f   : > { %4197 = vmatmul.mubr.msk.f32.gmra.mrb[22].mxu0 %vm1275_vm2, %v1237_v20  ;;  %4248 = vmatmul.mubr.msk.f32.gmra.mrb[22].mxu1 %vm1275_vm2, %v1254_v21  ;;  %v1829_v20 = vld [vmem:[%s6502_s5 + $0xd8] sm:$0xff]  ;;  %v4467_v21 = vpack.c.bf16 %v1811_v18, %v1810_v17 }
 0x2a0   : > { %4199 = vmatprep.mubr.msk.f32.mxu0 %vm4968_vm1, %v4969_v51  ;;  %4250 = vmatprep.mubr.msk.f32.mxu1 %vm4968_vm1, %v4969_v51 }
 0x2a1   : > { %4468 = vmatpush3.bf16.msra.mxu0 %v4467_v21 }
 0x2a3   : > { %4200 = vmatmul.mubr.msk.f32.gmra.mrb[24].mxu0 %vm1275_vm2, %v1238_v22  ;;  %4251 = vmatmul.mubr.msk.f32.gmra.mrb[24].mxu1 %vm1275_vm2, %v1255_v23  ;;  %v4469_v22 = vpack.c.bf16 %v1829_v20, %v1828_v19  ;;  %v1812_v23 = vld [vmem:[%s6502_s5 + $0x50] sm:$0xff] }
 0x2a4   : > { %4202 = vmatprep.mubr.msk.f32.mxu0 %vm4968_vm1, %v4969_v51  ;;  %4253 = vmatprep.mubr.msk.f32.mxu1 %vm4968_vm1, %v4969_v51 }
 0x2a5   : > { %4470 = vmatprep.subr.bf16.mxu0 %v4469_v22 }
 0x2a7   : > { %4203 = vmatmul.mubr.msk.f32.gmra.mrb[26].mxu0 %vm1275_vm2, %v1239_v24  ;;  %4254 = vmatmul.mubr.msk.f32.gmra.mrb[26].mxu1 %vm1275_vm2, %v1256_v25  ;;  %v1813_v24 = vld [vmem:[%s6502_s5 + $0x58] sm:$0xff]  ;;  %v1830_v25 = vld [vmem:[%s6502_s5 + $0xe0] sm:$0xff] }
 0x2a8   : > { %4205 = vmatprep.mubr.msk.f32.mxu0 %vm4968_vm1, %v4969_v51  ;;  %4256 = vmatprep.mubr.msk.f32.mxu1 %vm4968_vm1, %v4969_v51 }
 0x2ab   : > { %4206 = vmatmul.mubr.msk.f32.gmra.mrb[28].mxu0 %vm1275_vm2, %v1240_v26  ;;  %4257 = vmatmul.mubr.msk.f32.gmra.mrb[28].mxu1 %vm1275_vm2, %v1257_v27  ;;  %v1831_v26 = vld [vmem:[%s6502_s5 + $0xe8] sm:$0xff]  ;;  %v4471_v27 = vpack.c.bf16 %v1813_v24, %v1812_v23 }
 0x2ac   : > { %4208 = vmatprep.mubr.msk.f32.mxu0 %vm4968_vm1, %v4969_v51  ;;  %4259 = vmatprep.mubr.msk.f32.mxu1 %vm4968_vm1, %v4969_v51 }
 0x2ad   : > { %4472 = vmatpush3.bf16.msra.mxu0 %v4471_v27 }
 0x2af   : > { %4209 = vmatmul.mubr.msk.f32.gmra.mrb[30].mxu0 %vm1275_vm2, %v1241_v28  ;;  %4260 = vmatmul.mubr.msk.f32.gmra.mrb[30].mxu1 %vm1275_vm2, %v1258_v29  ;;  %v4473_v28 = vpack.c.bf16 %v1831_v26, %v1830_v25  ;;  %v1814_v29 = vld [vmem:[%s6502_s5 + $0x60] sm:$0xff]  ;;  %v1816_v25 = vld [vmem:[%s6502_s5 + $0x70] sm:$0xff]  ;;  %v1817_v26 = vld [vmem:[%s6502_s5 + $0x78] sm:$0xff] }
 0x2b0   : > { %4211 = vmatprep.mubr.msk.f32.mxu0 %vm4968_vm1, %v4969_v51  ;;  %4262 = vmatprep.mubr.msk.f32.mxu1 %vm4968_vm1, %v4969_v51 }
 0x2b1   : > { %4474 = vmatprep.subr.bf16.mxu0 %v4473_v28 }
 0x2b3   : > { %4212 = vmatmul.mubr.msk.f32.gmra.mrb[32].mxu0 %vm1275_vm2, %v1242_v30  ;;  %4263 = vmatmul.mubr.msk.f32.gmra.mrb[32].mxu1 %vm1275_vm2, %v1259_v32  ;;  %v1815_v30 = vld [vmem:[%s6502_s5 + $0x68] sm:$0xff]  ;;  %v1832_v32 = vld [vmem:[%s6502_s5 + $0xf0] sm:$0xff] }
 0x2b4   : > { %4214 = vmatprep.mubr.msk.f32.mxu0 %vm4968_vm1, %v4969_v51  ;;  %4265 = vmatprep.mubr.msk.f32.mxu1 %vm4968_vm1, %v4969_v51 }
 0x2b7   : > { %4215 = vmatmul.mubr.msk.f32.gmra.mrb[34].mxu0 %vm1275_vm2, %v1243_v33  ;;  %4266 = vmatmul.mubr.msk.f32.gmra.mrb[34].mxu1 %vm1275_vm2, %v1260_v34  ;;  %v1833_v33 = vld [vmem:[%s6502_s5 + $0xf8] sm:$0xff]  ;;  %v4475_v34 = vpack.c.bf16 %v1815_v30, %v1814_v29  ;;  %v4479_v29 = vpack.c.bf16 %v1817_v26, %v1816_v25 }
 0x2b8   : > { %4217 = vmatprep.mubr.msk.f32.mxu0 %vm4968_vm1, %v4969_v51  ;;  %4268 = vmatprep.mubr.msk.f32.mxu1 %vm4968_vm1, %v4969_v51  ;;  %v1877_v25 = vld [vmem:[%s6503_s6 + $0x18] sm:$0xff] }
 0x2b9   : > { %4476 = vmatpush3.bf16.msra.mxu0 %v4475_v34  ;;  %v1851_v34 = vld [vmem:[%s6502_s5 + $0x188] sm:$0xff] }
 0x2bb   : > { %4218 = vmatmul.mubr.msk.f32.gmra.mrb[36].mxu0 %vm1275_vm2, %v1244_v35  ;;  %4269 = vmatmul.mubr.msk.f32.gmra.mrb[36].mxu1 %vm1275_vm2, %v1261_v36  ;;  %v4477_v35 = vpack.c.bf16 %v1833_v33, %v1832_v32  ;;  %v1850_v33 = vld [vmem:[%s6502_s5 + $0x180] sm:$0xff] }
 0x2bc   : > { %4220 = vmatprep.mubr.msk.f32.mxu0 %vm4968_vm1, %v4969_v51  ;;  %4271 = vmatprep.mubr.msk.f32.mxu1 %vm4968_vm1, %v4969_v51 }
 0x2bd   : > { %4478 = vmatprep.subr.bf16.mxu0 %v4477_v35  ;;  %v4481_v35 = vpack.c.bf16 %v1851_v34, %v1850_v33 }
 0x2be   : > { %4480 = vmatpush3.bf16.msra.mxu0 %v4479_v29 }
 0x2bf   : > { %4221 = vmatmul.mubr.msk.f32.gmra.mrb[38].mxu0 %vm1275_vm2, %v1245_v37  ;;  %4272 = vmatmul.mubr.msk.f32.gmra.mrb[38].mxu1 %vm1275_vm2, %v1262_v38 }
 0x2c0   : > { %4223 = vmatprep.mubr.msk.f32.mxu0 %vm4968_vm1, %v4969_v51  ;;  %4274 = vmatprep.mubr.msk.f32.mxu1 %vm4968_vm1, %v4969_v51 }
 0x2c1   : > { %4482 = vmatprep.subr.bf16.mxu0 %v4481_v35 }
 0x2c3   : > { %4224 = vmatmul.mubr.msk.f32.gmra.mrb[40].mxu0 %vm1275_vm2, %v1246_v39  ;;  %4275 = vmatmul.mubr.msk.f32.gmra.mrb[40].mxu1 %vm1275_vm2, %v1263_v40 }
 0x2c4   : > { %4277 = vmatprep.mubr.msk.f32.mxu1 %vm4968_vm1, %v4969_v51 }
 0x2c7   : > { %4278 = vmatmul.mubr.msk.f32.gmra.mrb[42].mxu1 %vm1275_vm2, %v1264_v41 }
 0x2c8   : > { %4280 = vmatprep.mubr.msk.f32.mxu1 %vm4968_vm1, %v4969_v51 }
 0x2cb   : > { %4281 = vmatmul.mubr.msk.f32.gmra.mrb[44].mxu1 %vm1275_vm2, %v1265_v42 }
 0x2cc   : > { %4283 = vmatprep.mubr.msk.f32.mxu1 %vm4968_vm1, %v4969_v51 }
 0x2cf   : > { %4284 = vmatmul.mubr.msk.f32.gmra.mrb[46].mxu1 %vm1275_vm2, %v1266_v43 }
 0x2d0   : > { %4286 = vmatprep.mubr.msk.f32.mxu1 %vm4968_vm1, %v4969_v51 }
 0x2d3   : > { %4287 = vmatmul.mubr.msk.f32.gmra.mrb[48].mxu1 %vm1275_vm2, %v1267_v44 }
 0x2d4   : > { %4289 = vmatprep.mubr.msk.f32.mxu1 %vm4968_vm1, %v4969_v51 }
 0x2d7   : > { %4290 = vmatmul.mubr.msk.f32.gmra.mrb[50].mxu1 %vm1275_vm2, %v1268_v45 }
 0x2d8   : > { %4292 = vmatprep.mubr.msk.f32.mxu1 %vm4968_vm1, %v4969_v51 }
 0x2db   : > { %4293 = vmatmul.mubr.msk.f32.gmra.mrb[52].mxu1 %vm1275_vm2, %v1269_v46 }
 0x2dc   : > { %4295 = vmatprep.mubr.msk.f32.mxu1 %vm4968_vm1, %v4969_v51 }
 0x2df   : > { %4296 = vmatmul.mubr.msk.f32.gmra.mrb[54].mxu1 %vm1275_vm2, %v1270_v47 }
 0x2e0   : > { %4298 = vmatprep.mubr.msk.f32.mxu1 %vm4968_vm1, %v4969_v51 }
 0x2e3   : > { %4299 = vmatmul.mubr.msk.f32.gmra.mrb[56].mxu1 %vm1275_vm2, %v1271_v48 }
 0x2e4   : > { %4301 = vmatprep.mubr.msk.f32.mxu1 %vm4968_vm1, %v4969_v51 }
 0x2e7   : > { %4302 = vmatmul.mubr.msk.f32.gmra.mrb[58].mxu1 %vm1275_vm2, %v1272_v49 }
 0x2e8   : > { %4304 = vmatprep.mubr.msk.f32.mxu1 %vm4968_vm1, %v4969_v51 }
 0x2eb   : > { %4305 = vmatmul.mubr.msk.f32.gmra.mrb[60].mxu1 %vm1275_vm2, %v1273_v52 }
 0x2ec   : > { %4307 = vmatprep.mubr.msk.f32.mxu1 %vm4968_vm1, %v4969_v51 }
 0x2ef   : > { %4308 = vmatmul.mubr.msk.f32.gmra.mrb[62].mxu1 %vm1275_vm2, %v1274_v53 }
 0x356   : > { %v5702_v36 = vpop.f32.mrb[8].mxu0  ;;  %v5704_v37 = vpop.f32.mrb[8].mxu1 }
 0x357   : > { %v4177_v38 = vpop.f32.mrb[9].mxu0  ;;  %v4228_v39 = vpop.f32.mrb[9].mxu1 }
 0x35a   : > { %v5706_v40 = vpop.f32.mrb[10].mxu0  ;;  %v5708_v41 = vpop.f32.mrb[10].mxu1 }
 0x35b   : > { %v4180_v42 = vpop.f32.mrb[11].mxu0  ;;  %v4231_v43 = vpop.f32.mrb[11].mxu1 }
 0x35e   : > { %v5710_v44 = vpop.f32.mrb[12].mxu0  ;;  %v5712_v45 = vpop.f32.mrb[12].mxu1 }
 0x35f   : > { %v4183_v46 = vpop.f32.mrb[13].mxu0  ;;  %v4234_v47 = vpop.f32.mrb[13].mxu1 }
 0x362   : > { %v5714_v48 = vpop.f32.mrb[14].mxu0  ;;  %v5716_v49 = vpop.f32.mrb[14].mxu1 }
 0x363   : > { %v4186_v52 = vpop.f32.mrb[15].mxu0  ;;  %v4237_v53 = vpop.f32.mrb[15].mxu1 }
 0x366   : > { %v5718_v54 = vpop.f32.mrb[16].mxu0  ;;  %v5720_v55 = vpop.f32.mrb[16].mxu1 }
 0x367   : > { %v4189_v56 = vpop.f32.mrb[17].mxu0  ;;  %v4240_v57 = vpop.f32.mrb[17].mxu1 }
 0x36a   : > { %v1502_v58 = vpop.f32.mrb[18].mxu0  ;;  %v5722_v59 = vpop.f32.mrb[18].mxu1 }
 0x36b   : > { %v4192_v60 = vpop.f32.mrb[19].mxu0  ;;  %v4243_v61 = vpop.f32.mrb[19].mxu1 }
 0x36e   : > { %v1507_v62 = vpop.f32.mrb[20].mxu0  ;;  %v5724_v63 = vpop.f32.mrb[20].mxu1 }
 0x36f   : > { %v4195_v0 = vpop.f32.mrb[21].mxu0  ;;  %v4246_v1 = vpop.f32.mrb[21].mxu1 }
 0x372   : > { %v1512_v2 = vpop.f32.mrb[22].mxu0  ;;  %v5726_v3 = vpop.f32.mrb[22].mxu1 }
 0x373   : > { %v4637_v4 = vpack.i.bf16 %v1512_v2, %v5704_v37  ;;  %v4198_v5 = vpop.f32.mrb[23].mxu0  ;;  %v4249_v6 = vpop.f32.mrb[23].mxu1 }
 0x376   : > { %v1517_v7 = vpop.f32.mrb[24].mxu0  ;;  %v1602_v8 = vpop.f32.mrb[24].mxu1 }
 0x377   : > { %v4642_v9 = vpack.i.bf16 %v1517_v7, %v5708_v41  ;;  %v4201_v10 = vpop.f32.mrb[25].mxu0  ;;  %v4252_v11 = vpop.f32.mrb[25].mxu1 }
 0x37a   : > { %v1522_v12 = vpop.f32.mrb[26].mxu0  ;;  %v1607_v13 = vpop.f32.mrb[26].mxu1 }
 0x37b   : > { %v4647_v14 = vpack.i.bf16 %v1522_v12, %v5712_v45  ;;  %v4204_v15 = vpop.f32.mrb[27].mxu0  ;;  %v4255_v16 = vpop.f32.mrb[27].mxu1 }
 0x37e   : > { %v5731_v17 = vpop.f32.mrb[28].mxu0  ;;  %v1612_v18 = vpop.f32.mrb[28].mxu1 }
 0x37f   : > { %v4207_v19 = vpop.f32.mrb[29].mxu0  ;;  %v4258_v20 = vpop.f32.mrb[29].mxu1 }
 0x382   : > { %v5733_v21 = vpop.f32.mrb[30].mxu0  ;;  %v1617_v22 = vpop.f32.mrb[30].mxu1 }
 0x383   : > { %v4210_v23 = vpop.f32.mrb[31].mxu0  ;;  %v4261_v24 = vpop.f32.mrb[31].mxu1 }
 0x384   : > { %v1878_v24 = vld [vmem:[%s6503_s6 + $0x20] sm:$0xff] }
 0x386   : > { %v5741_v27 = vpop.f32.mrb[32].mxu0  ;;  %v1622_v28 = vpop.f32.mrb[32].mxu1 }
 0x387   : > { %v4213_v30 = vpop.f32.mrb[33].mxu0  ;;  %v4264_v32 = vpop.f32.mrb[33].mxu1 }
 0x38a   : > { %v5749_v37 = vpop.f32.mrb[34].mxu0  ;;  %v5751_v38 = vpop.f32.mrb[34].mxu1 }
 0x38b   : > { %v4216_v39 = vpop.f32.mrb[35].mxu0  ;;  %v4267_v41 = vpop.f32.mrb[35].mxu1 }
 0x38e   : > { %v5753_v42 = vpop.f32.mrb[36].mxu0  ;;  %v5755_v43 = vpop.f32.mrb[36].mxu1 }
 0x38f   : > { %v4219_v45 = vpop.f32.mrb[37].mxu0  ;;  %v4270_v46 = vpop.f32.mrb[37].mxu1 }
 0x390   : > { %v1834_v45 = vld [vmem:[%s6502_s5 + $0x100] sm:$0xff]  ;;  %v1835_v46 = vld [vmem:[%s6502_s5 + $0x108] sm:$0xff] }
 0x392   : > { %v1552_v47 = vpop.f32.mrb[38].mxu0  ;;  %v5757_v52 = vpop.f32.mrb[38].mxu1 }
 0x393   : > { %v4627_v53 = vpack.i.bf16 %v1502_v58, %v1552_v47  ;;  %v4222_v56 = vpop.f32.mrb[39].mxu0  ;;  %v4273_v57 = vpop.f32.mrb[39].mxu1 }
 0x394   : > { %v1853_v56 = vld [vmem:[%s6502_s5 + $0x198] sm:$0xff] }
 0x395   : > { %4628 = vrot.lane.b32.xlu1 %v4627_v53, %s4965_s18  ;;  %v1852_v53 = vld [vmem:[%s6502_s5 + $0x190] sm:$0xff] }
 0x396   : > { %v1557_v60 = vpop.f32.mrb[40].mxu0  ;;  %v5760_v61 = vpop.f32.mrb[40].mxu1 }
 0x397   : > { %v4632_v0 = vpack.i.bf16 %v1507_v62, %v1557_v60  ;;  %v4276_v1 = vpop.f32.mrb[41].mxu1  ;;  %v4225_v2 = vpop.f32.mrb[41].mxu0 }
 0x399   : > { %4638 = vrot.lane.b32.xlu1 %v4637_v4, %s4965_s18  ;;  %4633 = vrot.lane.b32.xlu0 %v4632_v0, %s4965_s18  ;;  %v4483_v0 = vpack.c.bf16 %v1835_v46, %v1834_v45 }
 0x39a   : > { %v5764_v5 = vpop.f32.mrb[42].mxu1 }
 0x39b   : > { %v4279_v6 = vpop.f32.mrb[43].mxu1 }
 0x39c   : > { %v4485_v6 = vpack.c.bf16 %v1853_v56, %v1852_v53 }
 0x39d   : > { %4648 = vrot.lane.b32.xlu1 %v4647_v14, %s4965_s18  ;;  %4643 = vrot.lane.b32.xlu0 %v4642_v9, %s4965_s18 }
 0x39e   : > { %v1652_v58 = vpop.f32.mrb[44].mxu1 }
 0x39f   : > { %v4652_v7 = vpack.i.bf16 %v1602_v8, %v1652_v58  ;;  %v4282_v10 = vpop.f32.mrb[45].mxu1  ;;  %v1874_v8 = vld [vmem:[%s6503_s6] sm:$0xff]  ;;  %v1836_v58 = vld [vmem:[%s6502_s5 + $0x110] sm:$0xff] }
 0x3a1   : > { %4653 = vrot.lane.b32.xlu0 %v4652_v7, %s4965_s18  ;;  %v1837_v7 = vld [vmem:[%s6502_s5 + $0x118] sm:$0xff] }
 0x3a2   : > { %v1657_v11 = vpop.f32.mrb[46].mxu1 }
 0x3a3   : > { %v4657_v62 = vpack.i.bf16 %v1607_v13, %v1657_v11  ;;  %v4285_v12 = vpop.f32.mrb[47].mxu1 }
 0x3a5   : > { %4658 = vrot.lane.b32.xlu1 %v4657_v62, %s4965_s18  ;;  %v1854_v62 = vld [vmem:[%s6502_s5 + $0x1a0] sm:$0xff] }
 0x3a6   : > { %v1662_v4 = vpop.f32.mrb[48].mxu1 }
 0x3a7   : > { %v4662_v15 = vpack.i.bf16 %v1612_v18, %v1662_v4  ;;  %v4288_v16 = vpop.f32.mrb[49].mxu1  ;;  %v1876_v18 = vld [vmem:[%s6503_s6 + $0x10] sm:$0xff] }
 0x3a9   : > { %4663 = vrot.lane.b32.xlu0 %v4662_v15, %s4965_s18  ;;  %v4487_v15 = vpack.c.bf16 %v1837_v7, %v1836_v58 }
 0x3aa   : > { %v1667_v19 = vpop.f32.mrb[50].mxu1 }
 0x3ab   : > { %v4667_v20 = vpack.i.bf16 %v1617_v22, %v1667_v19  ;;  %v4291_v14 = vpop.f32.mrb[51].mxu1  ;;  %v1875_v22 = vld [vmem:[%s6503_s6 + $0x8] sm:$0xff] }
 0x3ac   : > { %v1838_v14 = vld [vmem:[%s6502_s5 + $0x120] sm:$0xff] }
 0x3ad   : > { %4668 = vrot.lane.b32.xlu1 %v4667_v20, %s4965_s18 }
 0x3ae   : > { %v1672_v9 = vpop.f32.mrb[52].mxu1 }
 0x3af   : > { %v4672_v23 = vpack.i.bf16 %v1622_v28, %v1672_v9  ;;  %v4294_v13 = vpop.f32.mrb[53].mxu1  ;;  %v1839_v9 = vld [vmem:[%s6502_s5 + $0x128] sm:$0xff] }
 0x3b0   : > { %v1856_v13 = vld [vmem:[%s6502_s5 + $0x1b0] sm:$0xff] }
 0x3b1   : > { %1881 = vperm.xlu1 %4626, %v1874_v8   ;;  %4673 = vrot.lane.b32.xlu0 %v4672_v23, %s4965_s18 }
 0x3b2   : > { %v5788_v26 = vpop.f32.mrb[54].mxu1 }
 0x3b3   : > { %v4297_v28 = vpop.f32.mrb[55].mxu1 }
 0x3b4   : > { %v1840_v28 = vld [vmem:[%s6502_s5 + $0x130] sm:$0xff] }
 0x3b5   : > { %1891 = vperm.xlu1 %4626, %v1876_v18   ;;  %1886 = vperm.xlu0 %4625, %v1875_v22  }
 0x3b6   : > { %v5790_v29 = vpop.f32.mrb[56].mxu1 }
 0x3b7   : > { %v4300_v30 = vpop.f32.mrb[57].mxu1 }
 0x3b8   : > { %v1841_v30 = vld [vmem:[%s6502_s5 + $0x138] sm:$0xff] }
 0x3b9   : > { %1901 = vperm.xlu1 %4626, %v1878_v24   ;;  %1896 = vperm.xlu0 %4625, %v1877_v25   ;;  %v4491_v24 = vpack.c.bf16 %v1839_v9, %v1838_v14  ;;  %v4495_v53 = vpack.c.bf16 %v1841_v30, %v1840_v28  ;;  %v1849_v14 = vld [vmem:[%s6502_s5 + $0x178] sm:$0xff] }
 0x3ba   : > { %v5792_v32 = vpop.f32.mrb[58].mxu1 }
 0x3bb   : > { %v4303_v33 = vpop.f32.mrb[59].mxu1 }
 0x3be   : > { %v5794_v34 = vpop.f32.mrb[60].mxu1 }
 0x3bf   : > { %v4306_v35 = vpop.f32.mrb[61].mxu1 }
 0x3c2   : > { %v5796_v39 = vpop.f32.mrb[62].mxu1 }
 0x3c3   : > { %v4309_v41 = vpop.f32.mrb[63].mxu1 }
 0x3c4   : > { %v1859_v41 = vld [vmem:[%s6502_s5 + $0x1c8] sm:$0xff] }
 0x407   : > { %v4629_v47 = vpop.permute.xlu1 %4628 }
 0x408   : > { %v4631_v57 = vunpack.i.h.bf16 %v4629_v47  ;;  %v4630_v60 = vunpack.i.l.bf16 %v4629_v47 }
 0x40a   : > { %v1787_v1 = vsel %vm1781_vm3, %v5731_v17, %v4630_v60  ;;  %v1782_v2 = vsel %vm1781_vm3, %v5702_v36, %v4631_v57  ;;  %v1855_v36 = vld [vmem:[%s6502_s5 + $0x1a8] sm:$0xff] }
 0x40b   : > { %v4639_v10 = vpop.permute.xlu1 %4638  ;;  %1983 = vmatprep.mubr.f32.mxu0 %v1787_v1  ;;  %v4634_v11 = vpop.permute.xlu0 %4633  ;;  %v4489_v20 = vpack.c.bf16 %v1855_v36, %v1854_v62  ;;  %v1843_v57 = vld [vmem:[%s6502_s5 + $0x148] sm:$0xff]  ;;  %v1861_v1 = vld [vmem:[%s6502_s5 + $0x1d8] sm:$0xff] }
 0x40c   : > { %v4640_v17 = vunpack.i.l.bf16 %v4639_v10  ;;  %v4636_v12 = vunpack.i.h.bf16 %v4634_v11  ;;  %v4635_v4 = vunpack.i.l.bf16 %v4634_v11  ;;  %1984 = vmatmul.mubr.f32.vlgmr.msra.gmra.mrb[42].mxu0 %v1782_v2  ;;  %v4641_v8 = vunpack.i.h.bf16 %v4639_v10  ;;  %v1845_v10 = vld [vmem:[%s6502_s5 + $0x158] sm:$0xff]  ;;  %v1863_v62 = vld [vmem:[%s6502_s5 + $0x1e8] sm:$0xff] }
 0x40d   : > { %4484 = vmatpush3.bf16.msra.mxu0 %v4483_v0 }
 0x40e   : > { %4486 = vmatprep.subr.bf16.mxu0 %v4485_v6  ;;  %v1788_v16 = vsel %vm1781_vm3, %v5733_v21, %v4635_v4  ;;  %v1783_v19 = vsel %vm1781_vm3, %v5706_v40, %v4636_v12  ;;  %v1857_v40 = vld [vmem:[%s6502_s5 + $0x1b8] sm:$0xff]  ;;  %v1789_v18 = vsel %vm1781_vm3, %v5741_v27, %v4640_v17  ;;  %v1784_v35 = vsel %vm1781_vm3, %v5710_v44, %v4641_v8  ;;  %v1858_v27 = vld [vmem:[%s6502_s5 + $0x1c0] sm:$0xff]  ;;  %v1847_v4 = vld [vmem:[%s6502_s5 + $0x168] sm:$0xff] }
 0x40f   : > { %v4644_v23 = vpop.permute.xlu0 %4643  ;;  %1988 = vmatprep.mubr.f32.mxu0 %v1788_v16  ;;  %v4649_v22 = vpop.permute.xlu1 %4648  ;;  %v4493_v25 = vpack.c.bf16 %v1857_v40, %v1856_v13  ;;  %v4497_v56 = vpack.c.bf16 %v1859_v41, %v1858_v27  ;;  %v1842_v44 = vld [vmem:[%s6502_s5 + $0x140] sm:$0xff]  ;;  %v1867_v13 = vld [vmem:[%s6502_s5 + $0x208] sm:$0xff] }
 0x410   : > { %v4645_v21 = vunpack.i.l.bf16 %v4644_v23  ;;  %1989 = vmatmul.mubr.f32.gmra.mrb[44].mxu0 %v1783_v19  ;;  %v4646_v33 = vunpack.i.h.bf16 %v4644_v23  ;;  %v4650_v45 = vunpack.i.l.bf16 %v4649_v22  ;;  %v4651_v60 = vunpack.i.h.bf16 %v4649_v22  ;;  %v1866_v23 = vld [vmem:[%s6502_s5 + $0x200] sm:$0xff] }
 0x411   : > { %4488 = vmatpush3.bf16.msra.mxu0 %v4487_v15  ;;  %1993 = vmatprep.mubr.f32.mxu0 %v1789_v18  ;;  %v4499_v58 = vpack.c.bf16 %v1843_v57, %v1842_v44  ;;  %v1864_v15 = vld [vmem:[%s6502_s5 + $0x1f0] sm:$0xff]  ;;  %v4514_v22 = vpack.c.bf16 %v1867_v13, %v1866_v23 }
 0x412   : > { %4490 = vmatprep.subr.bf16.mxu0 %v4489_v20  ;;  %v1790_v46 = vsel %vm1781_vm3, %v5749_v37, %v4645_v21  ;;  %v1785_v0 = vsel %vm1781_vm3, %v5714_v48, %v4646_v33  ;;  %v1860_v37 = vld [vmem:[%s6502_s5 + $0x1d0] sm:$0xff]  ;;  %v1791_v6 = vsel %vm1781_vm3, %v5753_v42, %v4650_v45  ;;  %v1786_v11 = vsel %vm1781_vm3, %v5718_v54, %v4651_v60  ;;  %v1862_v42 = vld [vmem:[%s6502_s5 + $0x1e0] sm:$0xff]  ;;  %v1873_v60 = vld [vmem:[%s6502_s5 + $0x238] sm:$0xff] }
 0x413   : > { %v4654_v47 = vpop.permute.xlu0 %4653  ;;  %v4501_v7 = vpack.c.bf16 %v1861_v1, %v1860_v37  ;;  %v1844_v48 = vld [vmem:[%s6502_s5 + $0x150] sm:$0xff]  ;;  %v4505_v12 = vpack.c.bf16 %v1863_v62, %v1862_v42  ;;  %v1846_v54 = vld [vmem:[%s6502_s5 + $0x160] sm:$0xff] }
 0x414   : > { %1994 = vmatmul.mubr.f32.gmra.mrb[46].mxu0 %v1784_v35  ;;  %v4655_v2 = vunpack.i.l.bf16 %v4654_v47  ;;  %v4503_v17 = vpack.c.bf16 %v1845_v10, %v1844_v48  ;;  %v4507_v16 = vpack.c.bf16 %v1847_v4, %v1846_v54  ;;  %v1848_v20 = vld [vmem:[%s6502_s5 + $0x170] sm:$0xff]  ;;  %v4656_v40 = vunpack.i.h.bf16 %v4654_v47  ;;  %v1870_v45 = vld [vmem:[%s6502_s5 + $0x220] sm:$0xff] }
 0x415   : > { %4492 = vmatpush3.bf16.msra.mxu0 %v4491_v24  ;;  %1998 = vmatprep.mubr.f32.mxu0 %v1790_v46  ;;  %v4511_v8 = vpack.c.bf16 %v1849_v14, %v1848_v20  ;;  %v1868_v24 = vld [vmem:[%s6502_s5 + $0x210] sm:$0xff]  ;;  %v1871_v46 = vld [vmem:[%s6502_s5 + $0x228] sm:$0xff] }
 0x416   : > { %4494 = vmatprep.subr.bf16.mxu0 %v4493_v25  ;;  %v1797_v36 = vsel %vm1781_vm3, %v5751_v38, %v4655_v2  ;;  %v1865_v38 = vld [vmem:[%s6502_s5 + $0x1f8] sm:$0xff]  ;;  %v1792_v30 = vsel %vm1781_vm3, %v5716_v49, %v4656_v40  ;;  %v4520_v44 = vpack.c.bf16 %v1871_v46, %v1870_v45  ;;  %v1872_v57 = vld [vmem:[%s6502_s5 + $0x230] sm:$0xff] }
 0x417   : > { %v4509_v19 = vpack.c.bf16 %v1865_v38, %v1864_v15  ;;  %v4659_v9 = vpop.permute.xlu1 %4658  ;;  %v1869_v25 = vld [vmem:[%s6502_s5 + $0x218] sm:$0xff]  ;;  %v4523_v1 = vpack.c.bf16 %v1873_v60, %v1872_v57 }
 0x418   : > { %1999 = vmatmul.mubr.f32.gmra.mrb[48].mxu0 %v1785_v0  ;;  %v4660_v21 = vunpack.i.l.bf16 %v4659_v9  ;;  %v4661_v28 = vunpack.i.h.bf16 %v4659_v9  ;;  %v4517_v41 = vpack.c.bf16 %v1869_v25, %v1868_v24 }
 0x419   : > { %4496 = vmatpush3.bf16.msra.mxu0 %v4495_v53  ;;  %2003 = vmatprep.mubr.f32.mxu0 %v1791_v6 }
 0x41a   : > { %4498 = vmatprep.subr.bf16.mxu0 %v4497_v56  ;;  %v1798_v35 = vsel %vm1781_vm3, %v5755_v43, %v4660_v21  ;;  %v1793_v47 = vsel %vm1781_vm3, %v5720_v55, %v4661_v28 }
 0x41b   : > { %v4664_v18 = vpop.permute.xlu0 %4663 }
 0x41c   : > { %2004 = vmatmul.mubr.f32.gmra.mrb[50].mxu0 %v1786_v11  ;;  %v4665_v33 = vunpack.i.l.bf16 %v4664_v18  ;;  %v4666_v49 = vunpack.i.h.bf16 %v4664_v18 }
 0x41d   : > { %4500 = vmatpush3.bf16.msra.mxu0 %v4499_v58  ;;  %2073 = vmatprep.mubr.f32.mxu0 %v1797_v36 }
 0x41e   : > { %4502 = vmatprep.subr.bf16.mxu0 %v4501_v7  ;;  %v1799_v43 = vsel %vm1781_vm3, %v5757_v52, %v4665_v33  ;;  %v1794_v0 = vsel %vm1781_vm3, %v5722_v59, %v4666_v49 }
 0x41f   : > { %v4669_v27 = vpop.permute.xlu1 %4668 }
 0x420   : > { %v4670_v53 = vunpack.i.l.bf16 %v4669_v27  ;;  %v4671_v55 = vunpack.i.h.bf16 %v4669_v27 }
 0x421   : > { %4504 = vmatpush3.bf16.msra.mxu0 %v4503_v17 }
 0x422   : > { %4506 = vmatprep.subr.bf16.mxu0 %v4505_v12  ;;  %v1800_v52 = vsel %vm1781_vm3, %v5760_v61, %v4670_v53  ;;  %v1795_v6 = vsel %vm1781_vm3, %v5724_v63, %v4671_v55  ;;  %v2200_v63 = vld [vmem:[%s6504_s7 + $0x8] sm:$0xff] }
 0x423   : > { %v4674_v56 = vpop.permute.xlu0 %4673 }
 0x424   : > { %v4675_v37 = vunpack.i.l.bf16 %v4674_v56  ;;  %v4676_v2 = vunpack.i.h.bf16 %v4674_v56 }
 0x425   : > { %4508 = vmatpush3.bf16.msra.mxu0 %v4507_v16 }
 0x426   : > { %4510 = vmatprep.subr.bf16.mxu0 %v4509_v19  ;;  %v1801_v58 = vsel %vm1781_vm3, %v5764_v5, %v4675_v37  ;;  %v1796_v59 = vsel %vm1781_vm3, %v5726_v3, %v4676_v2  ;;  %v2205_v3 = vld [vmem:[%s6504_s7 + $0x30] sm:$0xff]  ;;  %v2199_v5 = vld [vmem:[%s6504_s7] sm:$0xff]  ;;  %v2206_v37 = vld [vmem:[%s6504_s7 + $0x38] sm:$0xff] }
 0x427   : > { %v4525_v61 = vpack.c.bf16 %v2205_v3, %v2200_v63 }
 0x429   : > { %4512 = vmatpush3.bf16.msra.mxu0 %v4511_v8 }
 0x42a   : > { %4513 = vmatprep.subr.bf16.mxu0 %v4967_v50 }
 0x42c   : > { %2074 = vmatmul.mubr.f32.vlgmr.msra.gmra.mrb[52].mxu0 %v1792_v30 }
 0x42d   : > { %2078 = vmatprep.mubr.f32.mxu0 %v1798_v35  ;;  %4515 = vmatpush3.bf16.msra.mxu0 %v4514_v22 }
 0x42e   : > { %4516 = vmatprep.subr.bf16.mxu0 %v4967_v50 }
 0x430   : > { %2079 = vmatmul.mubr.f32.gmra.mrb[54].mxu0 %v1793_v47  ;;  %v1882_v14 = vpop.permute.xlu1 %1881 }
 0x431   : > { %2083 = vmatprep.mubr.f32.mxu0 %v1799_v43  ;;  %4518 = vmatpush3.bf16.msra.mxu0 %v4517_v41 }
 0x432   : > { %4519 = vmatprep.subr.bf16.mxu0 %v4967_v50 }
 0x434   : > { %2084 = vmatmul.mubr.f32.gmra.mrb[56].mxu0 %v1794_v0  ;;  %v1887_v21 = vpop.permute.xlu0 %1886  ;;  %v1892_v30 = vpop.permute.xlu1 %1891  ;;  %v2201_v0 = vld [vmem:[%s6504_s7 + $0x10] sm:$0xff] }
 0x435   : > { %2088 = vmatprep.mubr.f32.mxu0 %v1800_v52  ;;  %4521 = vmatpush3.bf16.msra.mxu0 %v4520_v44 }
 0x436   : > { %4522 = vmatprep.subr.bf16.mxu0 %v4967_v50 }
 0x438   : > { %2089 = vmatmul.mubr.f32.gmra.mrb[58].mxu0 %v1795_v6  ;;  %v1897_v46 = vpop.permute.xlu0 %1896  ;;  %v1902_v44 = vpop.permute.xlu1 %1901 }
 0x439   : > { %2093 = vmatprep.mubr.f32.mxu0 %v1801_v58  ;;  %4524 = vmatpush3.bf16.msra.mxu0 %v4523_v1  ;;  %v4531_v58 = vpack.c.bf16 %v2206_v37, %v2201_v0  ;;  %v2586_v37 = vld [vmem:[%s6505_s8 + $0x8] sm:$0xff] }
 0x43a   : > { %4526 = vmatprep.subr.bf16.mxu0 %v4525_v61  ;;  %2698 = vmatprep.mubr.f32.mxu1 %v2586_v37 }
 0x43c   : > { %2094 = vmatmul.mubr.f32.gmra.mrb[60].mxu0 %v1796_v59 }
 0x43d   : > { %4326 = vmatprep.mubr.msk.f32.mxu0 %vm4968_vm1, %v4969_v51 }
 0x440   : > { %4327 = vmatmul.mubr.msk.f32.vlgmr.msra.gmra.mrb[62].mxu0 %vm1781_vm3, %v5788_v26  ;;  %v2204_v26 = vld [vmem:[%s6504_s7 + $0x28] sm:$0xff] }
 0x441   : > { %4329 = vmatprep.mubr.msk.f32.mxu0 %vm4968_vm1, %v4969_v51 }
 0x444   : > { %4330 = vmatmul.mubr.msk.f32.gmra.mrb[64].mxu0 %vm1781_vm3, %v5790_v29  ;;  %v4527_v29 = vpack.c.bf16 %v2204_v26, %v2199_v5 }
 0x445   : > { %4332 = vmatprep.mubr.msk.f32.mxu0 %vm4968_vm1, %v4969_v51 }
 0x446   : > { %4528 = vmatpush1.bf16.msra.mxu0 %v4527_v29 }
 0x448   : > { %4333 = vmatmul.mubr.msk.f32.gmra.mrb[66].mxu0 %vm1781_vm3, %v5792_v32  ;;  %v2202_v32 = vld [vmem:[%s6504_s7 + $0x18] sm:$0xff] }
 0x449   : > { %4335 = vmatprep.mubr.msk.f32.mxu0 %vm4968_vm1, %v4969_v51 }
 0x44c   : > { %4336 = vmatmul.mubr.msk.f32.gmra.mrb[68].mxu0 %vm1781_vm3, %v5794_v34  ;;  %v2207_v34 = vld [vmem:[%s6504_s7 + $0x40] sm:$0xff] }
 0x44d   : > { %4338 = vmatprep.mubr.msk.f32.mxu0 %vm4968_vm1, %v4969_v51 }
 0x450   : > { %4339 = vmatmul.mubr.msk.f32.gmra.mrb[70].mxu0 %vm1781_vm3, %v5796_v39  ;;  %v4529_v39 = vpack.c.bf16 %v2207_v34, %v2202_v32 }
 0x451   : > { %2289 = vmatprep.mubr.f32.mxu0 %v4969_v51 }
 0x452   : > { %4530 = vmatprep.subr.bf16.mxu0 %v4529_v39 }
 0x4df   : > { %v3987_v7 = vpop.f32.mrb[42].mxu0 }
 0x4e0   : > { %v3988_v48 = vpop.f32.mrb[43].mxu0 }
 0x4e1   : > { %v3989_v10 = vadd.f32 %v3988_v48, %v3987_v7 }
 0x4e3   : > { %v3990_v11 = vpop.f32.mrb[44].mxu0  ;;  %v1986_v8 = vadd.f32 %v3989_v10, %v1882_v14 }
 0x4e4   : > { %v3991_v42 = vpop.f32.mrb[45].mxu0 }
 0x4e5   : > { %v3992_v62 = vadd.f32 %v3991_v42, %v3990_v11 }
 0x4e7   : > { %v3993_v36 = vpop.f32.mrb[46].mxu0  ;;  %v1991_v22 = vadd.f32 %v3992_v62, %v1887_v21 }
 0x4e8   : > { %v3994_v17 = vpop.f32.mrb[47].mxu0 }
 0x4e9   : > { %v3995_v12 = vadd.f32 %v3994_v17, %v3993_v36  ;;  %v2203_v17 = vld [vmem:[%s6504_s7 + $0x20] sm:$0xff] }
 0x4eb   : > { %v3996_v54 = vpop.f32.mrb[48].mxu0  ;;  %v1996_v35 = vadd.f32 %v3995_v12, %v1892_v30  ;;  %v2208_v12 = vld [vmem:[%s6504_s7 + $0x48] sm:$0xff] }
 0x4ec   : > { %v3997_v4 = vpop.f32.mrb[49].mxu0 }
 0x4ed   : > { %v3998_v15 = vadd.f32 %v3997_v4, %v3996_v54  ;;  %v4534_v54 = vpack.c.bf16 %v2208_v12, %v2203_v17 }
 0x4ef   : > { %v3999_v38 = vpop.f32.mrb[50].mxu0  ;;  %v2001_v47 = vadd.f32 %v3998_v15, %v1897_v46 }
 0x4f0   : > { %v4000_v16 = vpop.f32.mrb[51].mxu0 }
 0x4f1   : > { %v4001_v19 = vadd.f32 %v4000_v16, %v3999_v38 }
 0x4f3   : > { %v2006_v60 = vadd.f32 %v4001_v19, %v1902_v44 }
 0x4ff   : > { %v4034_v20 = vpop.f32.mrb[52].mxu0 }
 0x500   : > { %v4035_v9 = vpop.f32.mrb[53].mxu0 }
 0x501   : > { %v4036_v23 = vadd.f32 %v4035_v9, %v4034_v20 }
 0x503   : > { %v4037_v13 = vpop.f32.mrb[54].mxu0  ;;  %v2076_v40 = vadd.f32 %v4036_v23, %v1986_v8 }
 0x504   : > { %v4038_v18 = vpop.f32.mrb[55].mxu0 }
 0x505   : > { %v4039_v24 = vadd.f32 %v4038_v18, %v4037_v13 }
 0x507   : > { %v4040_v25 = vpop.f32.mrb[56].mxu0  ;;  %v2081_v28 = vadd.f32 %v4039_v24, %v1991_v22 }
 0x508   : > { %v4041_v33 = vpop.f32.mrb[57].mxu0 }
 0x509   : > { %v4042_v27 = vadd.f32 %v4041_v33, %v4040_v25 }
 0x50b   : > { %v4043_v41 = vpop.f32.mrb[58].mxu0  ;;  %v2086_v45 = vadd.f32 %v4042_v27, %v1996_v35 }
 0x50c   : > { %v4044_v49 = vpop.f32.mrb[59].mxu0 }
 0x50d   : > { %v4045_v53 = vadd.f32 %v4044_v49, %v4043_v41 }
 0x50f   : > { %v4046_v43 = vpop.f32.mrb[60].mxu0  ;;  %v2091_v56 = vadd.f32 %v4045_v53, %v2001_v47 }
 0x510   : > { %v4047_v57 = vpop.f32.mrb[61].mxu0 }
 0x511   : > { %v4048_v55 = vadd.f32 %v4047_v57, %v4046_v43 }
 0x513   : > { %v2165_v52 = vpop.f32.mrb[62].mxu0  ;;  %v2096_v1 = vadd.f32 %v4048_v55, %v2006_v60 }
 0x514   : > { %v2166_v2 = vadd.f32 %v2165_v52, %v2076_v40  ;;  %v4328_v6 = vpop.f32.mrb[63].mxu0 }
 0x516   : > { %v3755_v59 = vclamps-f32 %v2166_v2, 1.0 }
 0x517   : > { %v2170_v63 = vpop.f32.mrb[64].mxu0 }
 0x518   : > { %v2171_v3 = vadd.f32 %v2170_v63, %v2081_v28  ;;  %v4331_v61 = vpop.f32.mrb[65].mxu0  ;;  %3760 = vmatmul.mubr.msk.f32.vlgmr.msra.gmra.mrb[72].mxu0 %vm2209_vm4, %v3755_v59 }
 0x519   : > { %2295 = vmatprep.mubr.f32.mxu0 %v4969_v51  ;;  %4532 = vmatpush1.bf16.msra.mxu0 %v4531_v58  ;;  %v2597_v58 = vld [vmem:[%s6506_s9] sm:$0xff]  ;;  %v2598_v61 = vld [vmem:[%s6506_s9 + $0x8] sm:$0xff] }
 0x51a   : > { %v3756_v5 = vclamps-f32 %v2171_v3, 1.0  ;;  %4533 = vmatprep.subr.bf16.mxu0 %v4967_v50  ;;  %v2599_v3 = vld [vmem:[%s6506_s9 + $0x10] sm:$0xff] }
 0x51b   : > { %v2175_v26 = vpop.f32.mrb[66].mxu0 }
 0x51c   : > { %v2176_v29 = vadd.f32 %v2175_v26, %v2086_v45  ;;  %v4334_v32 = vpop.f32.mrb[67].mxu0  ;;  %3761 = vmatmul.mubr.msk.f32.gmra.mrb[74].mxu0 %vm2209_vm4, %v3756_v5 }
 0x51d   : > { %2301 = vmatprep.mubr.f32.mxu0 %v4969_v51 }
 0x51e   : > { %v3757_v34 = vclamps-f32 %v2176_v29, 1.0  ;;  %v2587_v29 = vld [vmem:[%s6505_s8 + $0x10] sm:$0xff] }
 0x51f   : > { %v2180_v39 = vpop.f32.mrb[68].mxu0 }
 0x520   : > { %v2181_v7 = vadd.f32 %v2180_v39, %v2091_v56  ;;  %3762 = vmatmul.mubr.msk.f32.gmra.mrb[76].mxu0 %vm2209_vm4, %v3757_v34  ;;  %v4337_v48 = vpop.f32.mrb[69].mxu0 }
 0x521   : > { %2307 = vmatprep.mubr.f32.mxu0 %v4969_v51 }
 0x522   : > { %v3758_v10 = vclamps-f32 %v2181_v7, 1.0 }
 0x523   : > { %v2185_v11 = vpop.f32.mrb[70].mxu0 }
 0x524   : > { %v2186_v42 = vadd.f32 %v2185_v11, %v2096_v1  ;;  %3763 = vmatmul.mubr.msk.f32.gmra.mrb[78].mxu0 %vm2209_vm4, %v3758_v10  ;;  %v4340_v62 = vpop.f32.mrb[71].mxu0 }
 0x525   : > { %2313 = vmatprep.mubr.f32.mxu0 %v4969_v51 }
 0x526   : > { %v3759_v36 = vclamps-f32 %v2186_v42, 1.0 }
 0x528   : > { %3764 = vmatmul.mubr.msk.f32.gmra.mrb[80].mxu0 %vm2209_vm4, %v3759_v36 }
 0x529   : > { %2384 = vmatprep.mubr.f32.mxu0 %v4969_v51 }
 0x52c   : > { %3765 = vmatmul.mubr.msk.f32.vlgmr.msra.gmra.mrb[82].mxu0 %vm2209_vm4, %v3755_v59 }
 0x52d   : > { %2390 = vmatprep.mubr.f32.mxu0 %v4969_v51  ;;  %4535 = vmatpush3.bf16.msra.mxu0 %v4534_v54 }
 0x530   : > { %3766 = vmatmul.mubr.msk.f32.gmra.mrb[84].mxu0 %vm2209_vm4, %v3756_v5 }
 0x531   : > { %2396 = vmatprep.mubr.f32.mxu0 %v4969_v51 }
 0x534   : > { %3767 = vmatmul.mubr.msk.f32.gmra.mrb[86].mxu0 %vm2209_vm4, %v3757_v34 }
 0x535   : > { %2402 = vmatprep.mubr.f32.mxu0 %v4969_v51 }
 0x538   : > { %3768 = vmatmul.mubr.msk.f32.gmra.mrb[88].mxu0 %vm2209_vm4, %v3758_v10 }
 0x539   : > { %2408 = vmatprep.mubr.f32.mxu0 %v4969_v51 }
 0x53c   : > { %3769 = vmatmul.mubr.msk.f32.gmra.mrb[90].mxu0 %vm2209_vm4, %v3759_v36 }
 0x53d   : > { %4345 = vmatprep.mubr.msk.f32.mxu0 %vm4968_vm1, %v4969_v51 }
 0x540   : > { %4346 = vmatmul.mubr.msk.f32.vlgmr.msra.gmra.mrb[92].mxu0 %vm2209_vm4, %v3755_v59 }
 0x541   : > { %4348 = vmatprep.mubr.msk.f32.mxu0 %vm4968_vm1, %v4969_v51 }
 0x544   : > { %4349 = vmatmul.mubr.msk.f32.gmra.mrb[94].mxu0 %vm2209_vm4, %v3756_v5 }
 0x545   : > { %4351 = vmatprep.mubr.msk.f32.mxu0 %vm4968_vm1, %v4969_v51 }
 0x548   : > { %4352 = vmatmul.mubr.msk.f32.gmra.mrb[96].mxu0 %vm2209_vm4, %v3757_v34  ;;  %v2600_v34 = vld [vmem:[%s6506_s9 + $0x18] sm:$0xff] }
 0x549   : > { %4354 = vmatprep.mubr.msk.f32.mxu0 %vm4968_vm1, %v4969_v51 }
 0x54c   : > { %4355 = vmatmul.mubr.msk.f32.gmra.mrb[98].mxu0 %vm2209_vm4, %v3758_v10 }
 0x54d   : > { %4357 = vmatprep.mubr.msk.f32.mxu0 %vm4968_vm1, %v4969_v51 }
 0x550   : > { %4358 = vmatmul.mubr.msk.f32.gmra.mrb[100].mxu0 %vm2209_vm4, %v3759_v36 }
 0x551   : > { %4386 = vmatprep.mubr.msk.f32.mxu0 %vm2621_vm5, %v2587_v29 }
 0x5eb   : > { %v6042_v4 = vpop.f32.mrb[72].mxu0 }
 0x5ec   : > { %v6044_v15 = vpop.f32.mrb[73].mxu0 }
 0x5ef   : > { %v6046_v38 = vpop.f32.mrb[74].mxu0 }
 0x5f0   : > { %v4687_v16 = vpack.i.bf16 %v6046_v38, %v6042_v4  ;;  %v4538_v19 = vpack.c.bf16 %v6046_v38, %v6042_v4  ;;  %v6052_v20 = vpop.f32.mrb[75].mxu0 }
 0x5f1   : > { %v4558_v14 = vpack.c.bf16 %v6052_v20, %v6044_v15 }
 0x5f3   : > { %v6056_v9 = vpop.f32.mrb[76].mxu0 }
 0x5f4   : > { %v6058_v8 = vpop.f32.mrb[77].mxu0 }
 0x5f5   : > { %v4677_v23 = vpack.i.bf16 %v6058_v8, %v6052_v20  ;;  %v2589_v20 = vld [vmem:[%s6505_s8 + $0x20] sm:$0xff] }
 0x5f7   : > { %4678 = vrot.lane.b32.xlu0 %v4677_v23, %s4965_s18  ;;  %v6063_v13 = vpop.f32.mrb[78].mxu0 }
 0x5f8   : > { %v4542_v40 = vpack.c.bf16 %v6063_v13, %v6056_v9  ;;  %v6067_v21 = vpop.f32.mrb[79].mxu0 }
 0x5f9   : > { %v4562_v18 = vpack.c.bf16 %v6067_v21, %v6058_v8  ;;  %v2592_v8 = vld [vmem:[%s6505_s8 + $0x38] sm:$0xff] }
 0x5fb   : > { %4688 = vrot.lane.b32.xlu0 %v4687_v16, %s4965_s18  ;;  %v6072_v22 = vpop.f32.mrb[80].mxu0 }
 0x5fc   : > { %v4697_v24 = vpack.i.bf16 %v6072_v22, %v6063_v13  ;;  %v6076_v25 = vpop.f32.mrb[81].mxu0 }
 0x5fd   : > { %v4682_v28 = vpack.i.bf16 %v6076_v25, %v6067_v21  ;;  %v2591_v21 = vld [vmem:[%s6505_s8 + $0x30] sm:$0xff] }
 0x5ff   : > { %4698 = vrot.lane.b32.xlu0 %v4697_v24, %s4965_s18  ;;  %4683 = vrot.lane.b32.xlu1 %v4682_v28, %s4965_s18  ;;  %v6082_v30 = vpop.f32.mrb[82].mxu0 }
 0x600   : > { %v4692_v33 = vpack.i.bf16 %v6082_v30, %v6056_v9  ;;  %v6086_v35 = vpop.f32.mrb[83].mxu0 }
 0x603   : > { %4693 = vrot.lane.b32.xlu1 %v4692_v33, %s4965_s18  ;;  %v6089_v27 = vpop.f32.mrb[84].mxu0 }
 0x604   : > { %v4544_v41 = vpack.c.bf16 %v6089_v27, %v6082_v30  ;;  %v6093_v45 = vpop.f32.mrb[85].mxu0 }
 0x605   : > { %v4564_v46 = vpack.c.bf16 %v6093_v45, %v6086_v35 }
 0x607   : > { %v6097_v49 = vpop.f32.mrb[86].mxu0 }
 0x608   : > { %v4702_v47 = vpack.i.bf16 %v6097_v49, %v6089_v27  ;;  %v2400_v53 = vpop.f32.mrb[87].mxu0 }
 0x609   : > { %v4717_v43 = vpack.i.bf16 %v6044_v15, %v2400_v53  ;;  %v2585_v15 = vld [vmem:[%s6505_s8] sm:$0xff] }
 0x60a   : > { %4703 = vrot.lane.b32.xlu1 %v4702_v47, %s4965_s18 }
 0x60b   : > { %v6103_v56 = vpop.f32.mrb[88].mxu0 }
 0x60c   : > { %v4707_v44 = vpack.i.bf16 %v6103_v56, %v6086_v35  ;;  %v4548_v57 = vpack.c.bf16 %v6103_v56, %v6097_v49  ;;  %v2406_v60 = vpop.f32.mrb[89].mxu0  ;;  %v2593_v35 = vld [vmem:[%s6505_s8 + $0x40] sm:$0xff] }
 0x60d   : > { %v4568_v55 = vpack.c.bf16 %v2406_v60, %v2400_v53 }
 0x60e   : > { %4708 = vrot.lane.b32.xlu0 %v4707_v44, %s4965_s18 }
 0x60f   : > { %v2410_v0 = vpop.f32.mrb[90].mxu0  ;;  %4569 = vmatprep.subr.bf16.mxu0 %v4568_v55 }
 0x610   : > { %v4712_v52 = vpack.i.bf16 %v6093_v45, %v2410_v0  ;;  %v6114_v1 = vpop.f32.mrb[91].mxu0  ;;  %4571 = vmatpush3.bf16.msra.mxu0 %v4568_v55  ;;  %v2594_v45 = vld [vmem:[%s6505_s8 + $0x48] sm:$0xff] }
 0x611   : > { %v4722_v2 = vpack.i.bf16 %v6114_v1, %v2406_v60 }
 0x612   : > { %4718 = vrot.lane.b32.xlu0 %v4717_v43, %s4965_s18  ;;  %4713 = vrot.lane.b32.xlu1 %v4712_v52, %s4965_s18 }
 0x613   : > { %v2481_v6 = vpop.f32.mrb[92].mxu0 }
 0x614   : > { %v4347_v59 = vpop.f32.mrb[93].mxu0 }
 0x616   : > { %2603 = vperm.xlu0 %4625, %v2597_v58   ;;  %4723 = vrot.lane.b32.xlu1 %v4722_v2, %s4965_s18 }
 0x617   : > { %v2486_v63 = vpop.f32.mrb[94].mxu0 }
 0x618   : > { %v6129_v5 = vpack.c.bf16 %v2486_v63, %v2481_v6  ;;  %v4350_v26 = vpop.f32.mrb[95].mxu0 }
 0x61a   : > { %2613 = vperm.xlu0 %4625, %v2599_v3   ;;  %2608 = vperm.xlu1 %4626, %v2598_v61  }
 0x61b   : > { %v2491_v32 = vpop.f32.mrb[96].mxu0 }
 0x61c   : > { %v4353_v39 = vpop.f32.mrb[97].mxu0 }
 0x61e   : > { %2618 = vperm.xlu1 %4626, %v2600_v34  }
 0x61f   : > { %v2496_v7 = vpop.f32.mrb[98].mxu0 }
 0x620   : > { %v6138_v48 = vpack.c.bf16 %v2496_v7, %v2491_v32  ;;  %v4356_v10 = vpop.f32.mrb[99].mxu0 }
 0x623   : > { %v6140_v11 = vpop.f32.mrb[100].mxu0 }
 0x624   : > { %v4359_v42 = vpop.f32.mrb[101].mxu0 }
 0x669   : > { %v4679_v62 = vpop.permute.xlu0 %4678 }
 0x66a   : > { %v4681_v36 = vunpack.i.h.bf16 %v4679_v62  ;;  %v4680_v17 = vunpack.i.l.bf16 %v4679_v62 }
 0x66c   : > { %v4536_v12 = vpack.c.bf16 %v4681_v36, %v4680_v17 }
 0x66d   : > { %v4689_v16 = vpop.permute.xlu0 %4688 }
 0x66e   : > { %4537 = vmatprep.subr.bf16.mxu1 %v4536_v12  ;;  %v4690_v30 = vunpack.i.l.bf16 %v4689_v16  ;;  %v4691_v4 = vunpack.i.h.bf16 %v4689_v16 }
 0x66f   : > { %4539 = vmatpush3.bf16.msra.mxu1 %v4538_v19 }
 0x670   : > { %v4546_v27 = vpack.c.bf16 %v4690_v30, %v6072_v22 }
 0x671   : > { %v4684_v54 = vpop.permute.xlu1 %4683  ;;  %v4699_v47 = vpop.permute.xlu0 %4698 }
 0x672   : > { %v4686_v23 = vunpack.i.h.bf16 %v4684_v54  ;;  %v4685_v24 = vunpack.i.l.bf16 %v4684_v54  ;;  %v4701_v19 = vunpack.i.h.bf16 %v4699_v47  ;;  %v4700_v43 = vunpack.i.l.bf16 %v4699_v47 }
 0x674   : > { %v4540_v28 = vpack.c.bf16 %v4686_v23, %v4685_v24  ;;  %v4554_v9 = vpack.c.bf16 %v4701_v19, %v4700_v43 }
 0x675   : > { %v4694_v33 = vpop.permute.xlu1 %4693 }
 0x676   : > { %4541 = vmatprep.subr.bf16.mxu1 %v4540_v28  ;;  %v4695_v49 = vunpack.i.l.bf16 %v4694_v33  ;;  %v4696_v53 = vunpack.i.h.bf16 %v4694_v33 }
 0x677   : > { %4543 = vmatpush3.bf16.msra.mxu1 %v4542_v40 }
 0x678   : > { %4545 = vmatprep.subr.bf16.mxu1 %v4544_v41  ;;  %v4550_v56 = vpack.c.bf16 %v4695_v49, %v4691_v4  ;;  %v4552_v44 = vpack.c.bf16 %v4696_v53, %v2410_v0 }
 0x67b   : > { %4547 = vmatpush3.bf16.msra.mxu1 %v4546_v27 }
 0x67c   : > { %v4704_v38 = vpop.permute.xlu1 %4703  ;;  %4549 = vmatprep.subr.bf16.mxu1 %v4548_v57 }
 0x67d   : > { %v4706_v60 = vunpack.i.h.bf16 %v4704_v38  ;;  %v4705_v55 = vunpack.i.l.bf16 %v4704_v38 }
 0x67f   : > { %4551 = vmatpush3.bf16.msra.mxu1 %v4550_v56  ;;  %v4556_v40 = vpack.c.bf16 %v4706_v60, %v4705_v55 }
 0x680   : > { %v4709_v37 = vpop.permute.xlu0 %4708  ;;  %4553 = vmatprep.subr.bf16.mxu1 %v4552_v44 }
 0x681   : > { %v4710_v13 = vunpack.i.l.bf16 %v4709_v37  ;;  %v4711_v2 = vunpack.i.h.bf16 %v4709_v37 }
 0x683   : > { %v4572_v22 = vpack.c.bf16 %v4710_v13, %v6114_v1  ;;  %4555 = vmatpush3.bf16.msra.mxu1 %v4554_v9  ;;  %v2812_v13 = vld [vmem:[%s6507_s10] sm:$0xff] }
 0x684   : > { %v4719_v41 = vpop.permute.xlu0 %4718  ;;  %v4714_v52 = vpop.permute.xlu1 %4713  ;;  %4557 = vmatprep.subr.bf16.mxu1 %v4556_v40  ;;  %v2813_v40 = vld [vmem:[%s6507_s10 + $0x8] sm:$0xff] }
 0x685   : > { %v4720_v57 = vunpack.i.l.bf16 %v4719_v41  ;;  %v4716_v6 = vunpack.i.h.bf16 %v4714_v52  ;;  %v4715_v58 = vunpack.i.l.bf16 %v4714_v52  ;;  %4573 = vmatprep.subr.bf16.mxu0 %v4572_v22  ;;  %v4721_v3 = vunpack.i.h.bf16 %v4719_v41  ;;  %v2816_v41 = vld [vmem:[%s6507_s10 + $0x20] sm:$0xff]  ;;  %v2817_v52 = vld [vmem:[%s6507_s10 + $0x28] sm:$0xff] }
 0x686   : > { %4575 = vmatpush3.bf16.msra.mxu0 %v4572_v22  ;;  %v2815_v22 = vld [vmem:[%s6507_s10 + $0x18] sm:$0xff] }
 0x687   : > { %v4576_v0 = vpack.c.bf16 %v4720_v57, %v4716_v6  ;;  %v4560_v59 = vpack.c.bf16 %v4715_v58, %v4711_v2  ;;  %4559 = vmatpush3.bf16.msra.mxu1 %v4558_v14  ;;  %v4566_v29 = vpack.c.bf16 %v4721_v3, %v6076_v25  ;;  %v2588_v14 = vld [vmem:[%s6505_s8 + $0x18] sm:$0xff]  ;;  %v2595_v25 = vld [vmem:[%s6505_s8 + $0x50] sm:$0xff]  ;;  %v2820_v6 = vld [vmem:[%s6507_s10 + $0x40] sm:$0xff] }
 0x688   : > { %v4724_v63 = vpop.permute.xlu1 %4723  ;;  %v2818_v2 = vld [vmem:[%s6507_s10 + $0x30] sm:$0xff]  ;;  %v2819_v57 = vld [vmem:[%s6507_s10 + $0x38] sm:$0xff]  ;;  %v4849_v58 = vld [vmem:[%s6508_s11] ss:$8 sps:$4 sm:$0xff]  }
 0x689   : > { %v4726_v61 = vunpack.i.h.bf16 %v4724_v63  ;;  %v4725_v1 = vunpack.i.l.bf16 %v4724_v63  ;;  %4561 = vmatprep.subr.bf16.mxu1 %v4560_v59  ;;  %4577 = vmatprep.subr.bf16.mxu0 %v4576_v0  ;;  %v4854_v59 = vld [vmem:[%s6508_s11 + $0x14] ss:$8 sps:$4 sm:$0xff]   ;;  %v4857_v63 = vld [vmem:[%s6508_s11 + $0x24] ss:$8 sps:$4 sm:$0xff]   ;;  %v4855_v3 = vld [vmem:[%s6508_s11 + $0x20] ss:$8 sps:$4 sm:$0xff]  }
 0x68a   : > { %4579 = vmatpush3.bf16.msra.mxu0 %v4576_v0  ;;  %v4851_v0 = vld [vmem:[%s6508_s11 + $0x4] ss:$8 sps:$4 sm:$0xff]  }
 0x68b   : > { %v4580_v26 = vpack.c.bf16 %v4726_v61, %v4725_v1  ;;  %4563 = vmatpush3.bf16.msra.mxu1 %v4562_v18  ;;  %v2590_v18 = vld [vmem:[%s6505_s8 + $0x28] sm:$0xff]  ;;  %v4860_v61 = vld [vmem:[%s6508_s11 + $0x34] ss:$8 sps:$4 sm:$0xff]   ;;  %v4858_v1 = vld [vmem:[%s6508_s11 + $0x30] ss:$8 sps:$4 sm:$0xff]  }
 0x68c   : > { %4565 = vmatprep.subr.bf16.mxu1 %v4564_v46  ;;  %v2596_v46 = vld [vmem:[%s6505_s8 + $0x58] sm:$0xff] }
 0x68d   : > { %4581 = vmatprep.subr.bf16.mxu0 %v4580_v26 }
 0x68e   : > { %4583 = vmatpush3.bf16.msra.mxu0 %v4580_v26  ;;  %v4863_v26 = vld [vmem:[%s6508_s11 + $0x44] ss:$8 sps:$4 sm:$0xff]  }
 0x68f   : > { %4567 = vmatpush3.bf16.msra.mxu1 %v4566_v29  ;;  %4585 = vmatprep.subr.bf16.mxu0 %v6129_v5  ;;  %v4861_v29 = vld [vmem:[%s6508_s11 + $0x40] ss:$8 sps:$4 sm:$0xff]  }
 0x690   : > { %3424 = vmatprep.subr.bf16.mxu1 %v4851_v0  ;;  %v4905_v0 = vld [vmem:[%s6508_s11 + $0x124] ss:$8 sps:$4 sm:$0xff]  }
 0x692   : > { %2699 = vmatmul.mubr.f32.vlgmr.msra.gmra.mrb[64].mxu1 %v2585_v15  ;;  %4587 = vmatpush3.bf16.msra.mxu0 %v6129_v5  ;;  %v4866_v15 = vld [vmem:[%s6508_s11 + $0x54] ss:$8 sps:$4 sm:$0xff]  }
 0x693   : > { %4589 = vmatprep.subr.bf16.mxu0 %v6138_v48  ;;  %2703 = vmatprep.mubr.f32.mxu1 %v2589_v20  ;;  %v4864_v20 = vld [vmem:[%s6508_s11 + $0x50] ss:$8 sps:$4 sm:$0xff]  }
 0x694   : > { %3425 = vmatpush1.bf16.msra.mxu1 %v4849_v58  ;;  %v4900_v58 = vld [vmem:[%s6508_s11 + $0x110] ss:$8 sps:$4 sm:$0xff]  }
 0x695   : > { %v2604_v7 = vpop.permute.xlu0 %2603  ;;  %3426 = vmatprep.subr.bf16.mxu1 %v4854_v59  ;;  %v4903_v59 = vld [vmem:[%s6508_s11 + $0x120] ss:$8 sps:$4 sm:$0xff]  }
 0x696   : > { %2704 = vmatmul.mubr.f32.gmra.mrb[66].mxu1 %v2588_v14  ;;  %4591 = vmatpush3.bf16.msra.mxu0 %v6138_v48  ;;  %v4869_v14 = vld [vmem:[%s6508_s11 + $0x64] ss:$8 sps:$4 sm:$0xff]  }
 0x697   : > { %4384 = vmatprep.subr.mxu0 %v6140_v11  ;;  %2708 = vmatprep.mubr.f32.mxu1 %v2592_v8  ;;  %v4867_v8 = vld [vmem:[%s6508_s11 + $0x60] ss:$8 sps:$4 sm:$0xff]  }
 0x699   : > { %v2614_v24 = vpop.permute.xlu0 %2613 }
 0x69a   : > { %2709 = vmatmul.mubr.f32.gmra.mrb[68].mxu1 %v2591_v21  ;;  %4385 = vmatpush3.msra.mxu0 %v6140_v11  ;;  %v2609_v11 = vpop.permute.xlu1 %2608  ;;  %v4872_v21 = vld [vmem:[%s6508_s11 + $0x74] ss:$8 sps:$4 sm:$0xff]  }
 0x69b   : > { %4387 = vmatmul.mubr.msk.f32.vlgmr.msra.gmra.mrb[102].mxu0 %vm2621_vm5, %v2590_v18  ;;  %2713 = vmatprep.mubr.f32.mxu1 %v2595_v25  ;;  %v4870_v18 = vld [vmem:[%s6508_s11 + $0x70] ss:$8 sps:$4 sm:$0xff]   ;;  %v4875_v25 = vld [vmem:[%s6508_s11 + $0x84] ss:$8 sps:$4 sm:$0xff]  }
 0x69c   : > { %4389 = vmatprep.mubr.msk.f32.mxu0 %vm2621_vm5, %v2593_v35  ;;  %4592 = vmatprep.subr.bf16.mxu0 %v4967_v50  ;;  %v4873_v35 = vld [vmem:[%s6508_s11 + $0x80] ss:$8 sps:$4 sm:$0xff]  }
 0x69e   : > { %2714 = vmatmul.mubr.f32.gmra.mrb[70].mxu1 %v2594_v45  ;;  %v2619_v19 = vpop.permute.xlu1 %2618  ;;  %v4878_v45 = vld [vmem:[%s6508_s11 + $0x94] ss:$8 sps:$4 sm:$0xff]  }
 0x69f   : > { %4390 = vmatmul.mubr.msk.f32.gmra.mrb[104].mxu0 %vm2621_vm5, %v2596_v46  ;;  %v4876_v46 = vld [vmem:[%s6508_s11 + $0x90] ss:$8 sps:$4 sm:$0xff]  }
 0x6a0   : > { %4400 = vmatprep.mubr.msk.f32.mxu0 %vm4968_vm1, %v4969_v51 }
 0x765   : > { %v4101_v5 = vpop.f32.mrb[64].mxu1 }
 0x766   : > { %v4102_v32 = vpop.f32.mrb[65].mxu1 }
 0x767   : > { %v4103_v34 = vadd.f32 %v4102_v32, %v4101_v5  ;;  %v4881_v5 = vld [vmem:[%s6508_s11 + $0xa4] ss:$8 sps:$4 sm:$0xff]   ;;  %v4879_v32 = vld [vmem:[%s6508_s11 + $0xa0] ss:$8 sps:$4 sm:$0xff]  }
 0x769   : > { %v4104_v39 = vpop.f32.mrb[66].mxu1  ;;  %v2701_v12 = vadd.f32 %v4103_v34, %v2604_v7  ;;  %v4884_v34 = vld [vmem:[%s6508_s11 + $0xb4] ss:$8 sps:$4 sm:$0xff]   ;;  %v4887_v7 = vld [vmem:[%s6508_s11 + $0xc4] ss:$8 sps:$4 sm:$0xff]  }
 0x76a   : > { %v4105_v48 = vpop.f32.mrb[67].mxu1 }
 0x76b   : > { %v4106_v10 = vadd.f32 %v4105_v48, %v4104_v39  ;;  %v4882_v39 = vld [vmem:[%s6508_s11 + $0xb0] ss:$8 sps:$4 sm:$0xff]   ;;  %v4885_v48 = vld [vmem:[%s6508_s11 + $0xc0] ss:$8 sps:$4 sm:$0xff]  }
 0x76d   : > { %v4107_v42 = vpop.f32.mrb[68].mxu1  ;;  %v2706_v62 = vadd.f32 %v4106_v10, %v2609_v11  ;;  %v4890_v10 = vld [vmem:[%s6508_s11 + $0xd4] ss:$8 sps:$4 sm:$0xff]   ;;  %v4888_v11 = vld [vmem:[%s6508_s11 + $0xd0] ss:$8 sps:$4 sm:$0xff]  }
 0x76e   : > { %v4108_v36 = vpop.f32.mrb[69].mxu1  ;;  %v4388_v17 = vpop.f32.mrb[102].mxu0 }
 0x76f   : > { %v4109_v54 = vadd.f32 %v4108_v36, %v4107_v42  ;;  %v2791_v16 = vadd.f32 %v4388_v17, %v2706_v62  ;;  %v2785_v23 = vpop.f32.mrb[103].mxu0  ;;  %v4893_v42 = vld [vmem:[%s6508_s11 + $0xe4] ss:$8 sps:$4 sm:$0xff]   ;;  %v4891_v62 = vld [vmem:[%s6508_s11 + $0xe0] ss:$8 sps:$4 sm:$0xff]  }
 0x770   : > { %v2786_v28 = vadd.f32 %v2785_v23, %v2701_v12  ;;  %v4896_v12 = vld [vmem:[%s6508_s11 + $0xf4] ss:$8 sps:$4 sm:$0xff]  }
 0x771   : > { %v3780_v30 = vclamps-f32 %v2791_v16, 1.0  ;;  %v4110_v33 = vpop.f32.mrb[70].mxu1  ;;  %v2711_v27 = vadd.f32 %v4109_v54, %v2614_v24  ;;  %v4894_v54 = vld [vmem:[%s6508_s11 + $0xf0] ss:$8 sps:$4 sm:$0xff]   ;;  %v4899_v24 = vld [vmem:[%s6508_s11 + $0x104] ss:$8 sps:$4 sm:$0xff]  }
 0x772   : > { %v3779_v49 = vclamps-f32 %v2786_v28, 1.0  ;;  %v4111_v47 = vpop.f32.mrb[71].mxu1  ;;  %v4391_v53 = vpop.f32.mrb[104].mxu0 }
 0x773   : > { %v4112_v4 = vadd.f32 %v4111_v47, %v4110_v33  ;;  %v2795_v38 = vpop.f32.mrb[105].mxu0  ;;  %v3055_v47 = vld [vmem:[%s6509_s12] sm:$0xff] }
 0x774   : > { %v4593_v43 = vpack.c.bf16 %v3780_v30, %v3779_v49  ;;  %v2796_v56 = vadd.f32 %v2795_v38, %v2711_v27 }
 0x775   : > { %v2716_v44 = vadd.f32 %v4112_v4, %v2619_v19 }
 0x776   : > { %4594 = vmatpush3.bf16.msra.mxu0 %v4593_v43  ;;  %v3781_v37 = vclamps-f32 %v2796_v56, 1.0 }
 0x777   : > { %v2801_v60 = vadd.f32 %v4391_v53, %v2716_v44  ;;  %4595 = vmatprep.subr.bf16.mxu0 %v4967_v50  ;;  %v2814_v50 = vld [vmem:[%s6507_s10 + $0x10] sm:$0xff] }
 0x779   : > { %v3782_v55 = vclamps-f32 %v2801_v60, 1.0 }
 0x77b   : > { %v4596_v9 = vpack.c.bf16 %v3782_v55, %v3781_v37 }
 0x77d   : > { %4597 = vmatpush3.bf16.msra.mxu0 %v4596_v9 }
 0x780   : > { %4401 = vmatmul.mubr.msk.f32.vlgmr.msra.gmra.mrb[106].mxu0 %vm1275_vm2, %v2812_v13 }
 0x781   : > { %4403 = vmatprep.mubr.msk.f32.mxu0 %vm4968_vm1, %v4969_v51 }
 0x784   : > { %4404 = vmatmul.mubr.msk.f32.gmra.mrb[108].mxu0 %vm1275_vm2, %v2813_v40 }
 0x785   : > { %4406 = vmatprep.mubr.msk.f32.mxu0 %vm4968_vm1, %v4969_v51 }
 0x788   : > { %4407 = vmatmul.mubr.msk.f32.gmra.mrb[110].mxu0 %vm1275_vm2, %v2814_v50 }
 0x789   : > { %4409 = vmatprep.mubr.msk.f32.mxu0 %vm4968_vm1, %v4969_v51 }
 0x78c   : > { %4410 = vmatmul.mubr.msk.f32.gmra.mrb[112].mxu0 %vm1275_vm2, %v2815_v22 }
 0x78d   : > { %4412 = vmatprep.mubr.msk.f32.mxu0 %vm4968_vm1, %v4969_v51 }
 0x790   : > { %4413 = vmatmul.mubr.msk.f32.gmra.mrb[114].mxu0 %vm1275_vm2, %v2816_v41 }
 0x791   : > { %4415 = vmatprep.mubr.msk.f32.mxu0 %vm4968_vm1, %v4969_v51 }
 0x794   : > { %4416 = vmatmul.mubr.msk.f32.gmra.mrb[116].mxu0 %vm1275_vm2, %v2817_v52 }
 0x795   : > { %4418 = vmatprep.mubr.msk.f32.mxu0 %vm4968_vm1, %v4969_v51 }
 0x798   : > { %4419 = vmatmul.mubr.msk.f32.gmra.mrb[118].mxu0 %vm1275_vm2, %v2818_v2 }
 0x799   : > { %4421 = vmatprep.mubr.msk.f32.mxu0 %vm4968_vm1, %v4969_v51 }
 0x79c   : > { %4422 = vmatmul.mubr.msk.f32.gmra.mrb[120].mxu0 %vm1275_vm2, %v2819_v57  ;;  %v4897_v57 = vld [vmem:[%s6508_s11 + $0x100] ss:$8 sps:$4 sm:$0xff]  }
 0x79d   : > { %4424 = vmatprep.mubr.msk.f32.mxu0 %vm4968_vm1, %v4969_v51  ;;  %v4852_v51 = vld [vmem:[%s6508_s11 + $0x10] ss:$8 sps:$4 sm:$0xff]  }
 0x79e   : > { %3427 = vmatpush1.bf16.msra.mxu1 %v4852_v51  ;;  %v4908_v51 = vld [vmem:[%s6508_s11 + $0x134] ss:$8 sps:$4 sm:$0xff]  }
 0x79f   : > { %3428 = vmatprep.subr.bf16.mxu1 %v4857_v63 }
 0x7a0   : > { %4425 = vmatmul.mubr.msk.f32.gmra.mrb[122].mxu0 %vm1275_vm2, %v2820_v6  ;;  %v4902_v6 = vld [vmem:[%s6508_s11 + $0x114] ss:$8 sps:$4 sm:$0xff]  }
 0x7a2   : > { %3429 = vmatpush1.bf16.msra.mxu1 %v4855_v3  ;;  %v4906_v3 = vld [vmem:[%s6508_s11 + $0x130] ss:$8 sps:$4 sm:$0xff]  }
 0x7a3   : > { %3430 = vmatprep.subr.bf16.mxu1 %v4860_v61 }
 0x7a6   : > { %3431 = vmatpush1.bf16.msra.mxu1 %v4858_v1  ;;  %v4911_v1 = vld [vmem:[%s6508_s11 + $0x144] ss:$8 sps:$4 sm:$0xff]  }
 0x7a7   : > { %3432 = vmatprep.subr.bf16.mxu1 %v4863_v26 }
 0x7aa   : > { %3433 = vmatpush1.bf16.msra.mxu1 %v4861_v29  ;;  %v4909_v29 = vld [vmem:[%s6508_s11 + $0x140] ss:$8 sps:$4 sm:$0xff]  }
 0x7ab   : > { %3434 = vmatprep.subr.bf16.mxu1 %v4866_v15 }
 0x7ae   : > { %3435 = vmatpush1.bf16.msra.mxu1 %v4864_v20  ;;  %v4914_v20 = vld [vmem:[%s6508_s11 + $0x154] ss:$8 sps:$4 sm:$0xff]  }
 0x7af   : > { %3436 = vmatprep.subr.bf16.mxu1 %v4869_v14  ;;  %v4912_v14 = vld [vmem:[%s6508_s11 + $0x150] ss:$8 sps:$4 sm:$0xff]  }
 0x7b2   : > { %3437 = vmatpush1.bf16.msra.mxu1 %v4867_v8  ;;  %v4917_v8 = vld [vmem:[%s6508_s11 + $0x164] ss:$8 sps:$4 sm:$0xff]  }
 0x7b3   : > { %3438 = vmatprep.subr.bf16.mxu1 %v4872_v21  ;;  %v4915_v21 = vld [vmem:[%s6508_s11 + $0x160] ss:$8 sps:$4 sm:$0xff]  }
 0x7b6   : > { %3439 = vmatpush1.bf16.msra.mxu1 %v4870_v18  ;;  %v4920_v18 = vld [vmem:[%s6508_s11 + $0x174] ss:$8 sps:$4 sm:$0xff]  }
 0x7b7   : > { %3440 = vmatprep.subr.bf16.mxu1 %v4875_v25  ;;  %v4918_v25 = vld [vmem:[%s6508_s11 + $0x170] ss:$8 sps:$4 sm:$0xff]  }
 0x7ba   : > { %3441 = vmatpush1.bf16.msra.mxu1 %v4873_v35  ;;  %v4923_v35 = vld [vmem:[%s6508_s11 + $0x184] ss:$8 sps:$4 sm:$0xff]  }
 0x7bb   : > { %3442 = vmatprep.subr.bf16.mxu1 %v4878_v45  ;;  %v4921_v45 = vld [vmem:[%s6508_s11 + $0x180] ss:$8 sps:$4 sm:$0xff]  }
 0x7be   : > { %3443 = vmatpush1.bf16.msra.mxu1 %v4876_v46  ;;  %v4926_v46 = vld [vmem:[%s6508_s11 + $0x194] ss:$8 sps:$4 sm:$0xff]  }
 0x7bf   : > { %3444 = vmatprep.subr.bf16.mxu1 %v4881_v5  ;;  %v4924_v5 = vld [vmem:[%s6508_s11 + $0x190] ss:$8 sps:$4 sm:$0xff]  }
 0x7c2   : > { %3445 = vmatpush1.bf16.msra.mxu1 %v4879_v32  ;;  %v4929_v32 = vld [vmem:[%s6508_s11 + $0x1a4] ss:$8 sps:$4 sm:$0xff]  }
 0x7c3   : > { %3446 = vmatprep.subr.bf16.mxu1 %v4884_v34  ;;  %v4927_v34 = vld [vmem:[%s6508_s11 + $0x1a0] ss:$8 sps:$4 sm:$0xff]  }
 0x7c6   : > { %3447 = vmatpush1.bf16.msra.mxu1 %v4882_v39  ;;  %v4932_v39 = vld [vmem:[%s6508_s11 + $0x1b4] ss:$8 sps:$4 sm:$0xff]  }
 0x7c7   : > { %3448 = vmatprep.subr.bf16.mxu1 %v4887_v7  ;;  %v4930_v7 = vld [vmem:[%s6508_s11 + $0x1b0] ss:$8 sps:$4 sm:$0xff]  }
 0x7ca   : > { %3449 = vmatpush1.bf16.msra.mxu1 %v4885_v48  ;;  %v4935_v48 = vld [vmem:[%s6508_s11 + $0x1c4] ss:$8 sps:$4 sm:$0xff]  }
 0x7cb   : > { %3450 = vmatprep.subr.bf16.mxu1 %v4890_v10  ;;  %v4933_v10 = vld [vmem:[%s6508_s11 + $0x1c0] ss:$8 sps:$4 sm:$0xff]  }
 0x7ce   : > { %3451 = vmatpush1.bf16.msra.mxu1 %v4888_v11  ;;  %v4938_v11 = vld [vmem:[%s6508_s11 + $0x1d4] ss:$8 sps:$4 sm:$0xff]  }
 0x7cf   : > { %3452 = vmatprep.subr.bf16.mxu1 %v4893_v42  ;;  %v4936_v42 = vld [vmem:[%s6508_s11 + $0x1d0] ss:$8 sps:$4 sm:$0xff]  }
 0x7d2   : > { %3453 = vmatpush1.bf16.msra.mxu1 %v4891_v62  ;;  %v4941_v62 = vld [vmem:[%s6508_s11 + $0x1e4] ss:$8 sps:$4 sm:$0xff]  }
 0x7d3   : > { %3454 = vmatprep.subr.bf16.mxu1 %v4896_v12 }
 0x7d6   : > { %3455 = vmatpush1.bf16.msra.mxu1 %v4894_v54  ;;  %v4942_v54 = vld [vmem:[%s6508_s11 + $0x1f0] ss:$8 sps:$4 sm:$0xff]  }
 0x7d7   : > { %3465 = vmatprep.subr.bf16.mxu1 %v4899_v24  ;;  %v4945_v24 = vld [vmem:[%s6508_s11 + $0x200] ss:$8 sps:$4 sm:$0xff]  }
 0x853   : > { %v2914_v36 = vpop.f32.mrb[106].mxu0 }
 0x854   : > { %v4402_v17 = vpop.f32.mrb[107].mxu0 }
 0x855   : > { %v4944_v17 = vld [vmem:[%s6508_s11 + $0x1f4] ss:$8 sps:$4 sm:$0xff]  }
 0x857   : > { %v2919_v16 = vpop.f32.mrb[108].mxu0 }
 0x858   : > { %v4405_v23 = vpop.f32.mrb[109].mxu0 }
 0x85b   : > { %v2924_v28 = vpop.f32.mrb[110].mxu0 }
 0x85c   : > { %v4408_v30 = vpop.f32.mrb[111].mxu0 }
 0x85d   : > { %v4950_v30 = vld [vmem:[%s6508_s11 + $0x214] ss:$8 sps:$4 sm:$0xff]  }
 0x85f   : > { %v2929_v33 = vpop.f32.mrb[112].mxu0 }
 0x860   : > { %v4727_v27 = vpack.i.bf16 %v2919_v16, %v2929_v33  ;;  %v4411_v49 = vpop.f32.mrb[113].mxu0  ;;  %v4947_v16 = vld [vmem:[%s6508_s11 + $0x204] ss:$8 sps:$4 sm:$0xff]   ;;  %v4948_v33 = vld [vmem:[%s6508_s11 + $0x210] ss:$8 sps:$4 sm:$0xff]  }
 0x861   : > { %v4951_v49 = vld [vmem:[%s6508_s11 + $0x220] ss:$8 sps:$4 sm:$0xff]  }
 0x862   : > { %4728 = vrot.lane.b32.xlu0 %v4727_v27, %s4965_s18  ;;  %v4953_v27 = vld [vmem:[%s6508_s11 + $0x224] ss:$8 sps:$4 sm:$0xff]  }
 0x863   : > { %v6358_v53 = vpop.f32.mrb[114].mxu0 }
 0x864   : > { %v4414_v4 = vpop.f32.mrb[115].mxu0 }
 0x866   : > { %3058 = vperm.xlu0 %4625, %v3055_v47   ;;  %v4956_v47 = vld [vmem:[%s6508_s11 + $0x234] ss:$8 sps:$4 sm:$0xff]  }
 0x867   : > { %v2939_v38 = vpop.f32.mrb[116].mxu0 }
 0x868   : > { %v4417_v19 = vpop.f32.mrb[117].mxu0 }
 0x86b   : > { %v2944_v43 = vpop.f32.mrb[118].mxu0 }
 0x86c   : > { %v4420_v56 = vpop.f32.mrb[119].mxu0 }
 0x86f   : > { %v2949_v44 = vpop.f32.mrb[120].mxu0 }
 0x870   : > { %v4732_v60 = vpack.i.bf16 %v2939_v38, %v2949_v44  ;;  %v4423_v55 = vpop.f32.mrb[121].mxu0 }
 0x872   : > { %4733 = vrot.lane.b32.xlu1 %v4732_v60, %s4965_s18 }
 0x873   : > { %v6361_v37 = vpop.f32.mrb[122].mxu0 }
 0x874   : > { %v4426_v9 = vpop.f32.mrb[123].mxu0 }
 0x8d4   : > { %v4729_v13 = vpop.permute.xlu0 %4728 }
 0x8d5   : > { %v4731_v40 = vunpack.i.h.bf16 %v4729_v13  ;;  %v4730_v50 = vunpack.i.l.bf16 %v4729_v13 }
 0x8d7   : > { %v2974_v22 = vsel %vm1781_vm3, %v2914_v36, %v4731_v40  ;;  %v2975_v41 = vsel %vm1781_vm3, %v2924_v28, %v4730_v50  ;;  %v4939_v36 = vld [vmem:[%s6508_s11 + $0x1e0] ss:$8 sps:$4 sm:$0xff]  }
 0x8d8   : > { %v2978_v52 = vpack.c.bf16 %v2974_v22, %v2974_v22  ;;  %v2979_v2 = vpack.c.bf16 %v2975_v41, %v2975_v41 }
 0x8da   : > { %3456 = vmatprep.mubr.bf16.mxu1 %v2979_v2 }
 0x8db   : > { %3457 = vmatmul.mubr.bf16.vlgmr.msra.gmra.mrb[72].mxu1 %v2978_v52 }
 0x8dc   : > { %3466 = vmatpush1.bf16.msra.mxu1 %v4897_v57 }
 0x8dd   : > { %3467 = vmatprep.subr.bf16.mxu1 %v4902_v6 }
 0x8e0   : > { %3468 = vmatpush1.bf16.msra.mxu1 %v4900_v58 }
 0x8e1   : > { %3469 = vmatprep.subr.bf16.mxu1 %v4905_v0 }
 0x8e4   : > { %3470 = vmatpush1.bf16.msra.mxu1 %v4903_v59  ;;  %v4734_v63 = vpop.permute.xlu1 %4733 }
 0x8e5   : > { %v4735_v61 = vunpack.i.l.bf16 %v4734_v63  ;;  %3471 = vmatprep.subr.bf16.mxu1 %v4908_v51  ;;  %v4736_v12 = vunpack.i.h.bf16 %v4734_v63  ;;  %v3059_v4 = vpop.permute.xlu0 %3058 }
 0x8e7   : > { %v2977_v26 = vsel %vm1781_vm3, %v2944_v43, %v4735_v61  ;;  %v2976_v23 = vsel %vm1781_vm3, %v6358_v53, %v4736_v12  ;;  %v2982_v53 = vpack.c.bf16 %v6361_v37, %v6361_v37 }
 0x8e8   : > { %3472 = vmatpush1.bf16.msra.mxu1 %v4906_v3  ;;  %v2981_v15 = vpack.c.bf16 %v2977_v26, %v2977_v26  ;;  %v2980_v28 = vpack.c.bf16 %v2976_v23, %v2976_v23 }
 0x8e9   : > { %3473 = vmatprep.subr.bf16.mxu1 %v4911_v1 }
 0x8ea   : > { %3497 = vmatprep.mubr.bf16.mxu1 %v2981_v15 }
 0x8ec   : > { %3474 = vmatpush1.bf16.msra.mxu1 %v4909_v29 }
 0x8ed   : > { %3475 = vmatprep.subr.bf16.mxu1 %v4914_v20 }
 0x8f0   : > { %3476 = vmatpush1.bf16.msra.mxu1 %v4912_v14 }
 0x8f1   : > { %3477 = vmatprep.subr.bf16.mxu1 %v4917_v8 }
 0x8f4   : > { %3478 = vmatpush1.bf16.msra.mxu1 %v4915_v21 }
 0x8f5   : > { %3479 = vmatprep.subr.bf16.mxu1 %v4920_v18 }
 0x8f8   : > { %3480 = vmatpush1.bf16.msra.mxu1 %v4918_v25 }
 0x8f9   : > { %3481 = vmatprep.subr.bf16.mxu1 %v4923_v35 }
 0x8fc   : > { %3482 = vmatpush1.bf16.msra.mxu1 %v4921_v45 }
 0x8fd   : > { %3483 = vmatprep.subr.bf16.mxu1 %v4926_v46 }
 0x900   : > { %3484 = vmatpush1.bf16.msra.mxu1 %v4924_v5 }
 0x901   : > { %3485 = vmatprep.subr.bf16.mxu1 %v4929_v32 }
 0x904   : > { %3486 = vmatpush1.bf16.msra.mxu1 %v4927_v34 }
 0x905   : > { %3487 = vmatprep.subr.bf16.mxu1 %v4932_v39 }
 0x908   : > { %3488 = vmatpush1.bf16.msra.mxu1 %v4930_v7 }
 0x909   : > { %3489 = vmatprep.subr.bf16.mxu1 %v4935_v48 }
 0x90c   : > { %3490 = vmatpush1.bf16.msra.mxu1 %v4933_v10 }
 0x90d   : > { %3491 = vmatprep.subr.bf16.mxu1 %v4938_v11 }
 0x910   : > { %3492 = vmatpush1.bf16.msra.mxu1 %v4936_v42 }
 0x911   : > { %3493 = vmatprep.subr.bf16.mxu1 %v4941_v62 }
 0x914   : > { %3494 = vmatpush1.bf16.msra.mxu1 %v4939_v36 }
 0x915   : > { %3495 = vmatprep.subr.bf16.mxu1 %v4944_v17 }
 0x918   : > { %3496 = vmatpush1.bf16.msra.mxu1 %v4942_v54 }
 0x919   : > { %3506 = vmatprep.subr.bf16.mxu1 %v4947_v16 }
 0x91b   : > { %3498 = vmatmul.mubr.bf16.vlgmr.msra.gmra.mrb[72].mxu1 %v2980_v28 }
 0x91c   : > { %3507 = vmatpush1.bf16.msra.mxu1 %v4945_v24  ;;  %3538 = vmatprep.mubr.bf16.mxu1 %v4966_v31  ;;  %v4954_v31 = vld [vmem:[%s6508_s11 + $0x230] ss:$8 sps:$4 sm:$0xff]  }
 0x91d   : > { %3508 = vmatprep.subr.bf16.mxu1 %v4950_v30 }
 0x920   : > { %3509 = vmatpush1.bf16.msra.mxu1 %v4948_v33 }
 0x921   : > { %3510 = vmatprep.subr.bf16.mxu1 %v4953_v27 }
 0x924   : > { %3511 = vmatpush1.bf16.msra.mxu1 %v4951_v49 }
 0x925   : > { %3512 = vmatprep.subr.bf16.mxu1 %v4956_v47 }
 0x928   : > { %3513 = vmatpush1.bf16.msra.mxu1 %v4954_v31 }
 0x92b   : > { %3864 = vmatmul.mubr.msk.bf16.vlgmr.msra.gmra.mrb[72].mxu1 %vm1781_vm3, %v2982_v53 }
 0x9fe   : > { %v3540_v38 = vpop.f32.mrb[72].mxu1 }
 0x9ff   : > { %v4602_v19 = vadd.f32 %v3540_v38, %v3059_v4  ;;  %v3542_v43 = vpop.f32.mrb[73].mxu1 }
 0xa00   : > { %v4603_v56 = vadd.f32 %v3542_v43, %v3059_v4  ;;  %v3544_v44 = vpop.f32.mrb[74].mxu1 }
 0xa01   : > { %v3865_v60 = vclamps-f32 %v4602_v19, 1.0  ;;  %v3545_v55 = vpop.f32.mrb[75].mxu1 }
 0xa02   : > { %v3866_v9 = vclamps-f32 %v4603_v56, 1.0 }
 0xa03   : > { %3551 = vst [vmem:[%s440_s22] sm:$0xff] %v3865_v60 }
 0xa04   : > { %3552 = vst [vmem:[%s440_s22 + $0x8] sm:$0xff] %v3866_v9 }
 0xa05 PF: > { %s23_s25 = sadd.s32 1, %s4963_s25  }
 0xa06   : > { %p20_p4 = scmp.ge.s32.totalorder %s23_s25, 4  }
 0xa08   :  { %22 = sbr.rel (!%p20_p4) target bundleno = 1 (0x1), region = 102 }

</bundles_post_ra>
